<compile_context>
chip_gen: v6e
topology: v6e:2x2x1
jax: 0.10.0
libtpu: 0.0.40
codegen_flags: <defaults>
</compile_context>

<pallas_src>
import math
import functools

import jax
import jax.numpy as jnp
from jax.experimental import pallas as pl
from jax.experimental.pallas import tpu as pltpu


# ----------------------------------------------------------------------------
# Small synthetic config (mirrors the YAML structure the PyTorch module loads)
# ----------------------------------------------------------------------------
CONFIG = {
    "model": {
        "model_config": {
            "hidden_size": 128,
            "intermediate_size": 256,
            "num_attention_heads": 4,
            "num_key_value_heads": 2,
            "num_hidden_layers": 2,
            "vocab_size": 512,
            "max_position_embeddings": 2048,
            "rope_theta": 10000.0,
            "rms_norm_eps": 1e-5,
        },
        "init_method": {"std": 0.02},
    }
}


def _pick_tile(dim, cap):
    """Largest divisor of `dim` that is <= cap (halving from cap)."""
    if dim <= cap:
        return dim
    t = cap
    while dim % t != 0:
        t //= 2
    return t


# ----------------------------------------------------------------------------
# Pallas kernels
# ----------------------------------------------------------------------------
def _rmsnorm_matmul_kernel(x_ref, g_ref, w_ref, o_ref, *, eps):
    # x: [tm, K] f32, g: [1, K] f32, w: [K, tn] bf16 -> o: [tm, tn] f32
    x = x_ref[...]
    var = jnp.mean(x * x, axis=-1, keepdims=True)
    xn = ((x * jax.lax.rsqrt(var + eps)) * g_ref[...]).astype(jnp.bfloat16)
    o_ref[...] = jnp.dot(xn, w_ref[...], preferred_element_type=jnp.float32)


def rmsnorm_matmul(x, gamma, w_bf16, eps, *, tm_cap=256, tn_cap=256):
    """Fused RMSNorm(x) @ W.  x [M, K] f32, gamma [1, K] f32, w [K, N] bf16."""
    M, K = x.shape
    _, N = w_bf16.shape
    tm = _pick_tile(M, tm_cap)
    tn = _pick_tile(N, tn_cap)
    return pl.pallas_call(
        functools.partial(_rmsnorm_matmul_kernel, eps=eps),
        out_shape=jax.ShapeDtypeStruct((M, N), jnp.float32),
        grid=(M // tm, N // tn),
        in_specs=[
            pl.BlockSpec((tm, K), lambda i, j: (i, 0)),
            pl.BlockSpec((1, K), lambda i, j: (0, 0)),
            pl.BlockSpec((K, tn), lambda i, j: (0, j)),
        ],
        out_specs=pl.BlockSpec((tm, tn), lambda i, j: (i, j)),
        compiler_params=pltpu.CompilerParams(
            dimension_semantics=("parallel", "parallel")),
    )(x, gamma, w_bf16)


def _matmul_residual_kernel(x_ref, w_ref, r_ref, o_ref):
    # o = residual + x @ w  (x f32 -> bf16 at MXU boundary, f32 accumulate)
    o_ref[...] = r_ref[...] + jnp.dot(
        x_ref[...].astype(jnp.bfloat16), w_ref[...],
        preferred_element_type=jnp.float32)


def matmul_residual(x, w_bf16, residual, *, tm_cap=256, tn_cap=256):
    """x [M, K] f32 @ w [K, N] bf16 + residual [M, N] f32 -> [M, N] f32."""
    M, K = x.shape
    _, N = w_bf16.shape
    tm = _pick_tile(M, tm_cap)
    tn = _pick_tile(N, tn_cap)
    return pl.pallas_call(
        _matmul_residual_kernel,
        out_shape=jax.ShapeDtypeStruct((M, N), jnp.float32),
        grid=(M // tm, N // tn),
        in_specs=[
            pl.BlockSpec((tm, K), lambda i, j: (i, 0)),
            pl.BlockSpec((K, tn), lambda i, j: (0, j)),
            pl.BlockSpec((tm, tn), lambda i, j: (i, j)),
        ],
        out_specs=pl.BlockSpec((tm, tn), lambda i, j: (i, j)),
        compiler_params=pltpu.CompilerParams(
            dimension_semantics=("parallel", "parallel")),
    )(x, w_bf16, residual)


def _mlp_kernel(x_ref, g_ref, wgu_ref, wd_ref, o_ref, *, eps, inter):
    # Fused: RMSNorm -> [gate|up] matmul -> SiLU(g)*u -> down matmul -> +residual
    x = x_ref[...]                                                  # [tm, D] f32
    var = jnp.mean(x * x, axis=-1, keepdims=True)
    xn = ((x * jax.lax.rsqrt(var + eps)) * g_ref[...]).astype(jnp.bfloat16)
    gu = jnp.dot(xn, wgu_ref[...], preferred_element_type=jnp.float32)  # [tm, 2I]
    g = gu[:, :inter]
    u = gu[:, inter:]
    mid = (g * jax.nn.sigmoid(g)) * u                               # SiLU in f32 (VPU/EUP)
    o_ref[...] = x + jnp.dot(mid.astype(jnp.bfloat16), wd_ref[...],
                             preferred_element_type=jnp.float32)


def mlp_block(x, gamma, wgu_bf16, wd_bf16, eps, inter, *, tm_cap=256):
    """Fused post-attn RMSNorm + SwiGLU MLP + residual.  x [M, D] f32."""
    M, D = x.shape
    two_i = wgu_bf16.shape[1]
    tm = _pick_tile(M, tm_cap)
    return pl.pallas_call(
        functools.partial(_mlp_kernel, eps=eps, inter=inter),
        out_shape=jax.ShapeDtypeStruct((M, D), jnp.float32),
        grid=(M // tm,),
        in_specs=[
            pl.BlockSpec((tm, D), lambda i: (i, 0)),
            pl.BlockSpec((1, D), lambda i: (0, 0)),
            pl.BlockSpec((D, two_i), lambda i: (0, 0)),
            pl.BlockSpec((inter, D), lambda i: (0, 0)),
        ],
        out_specs=pl.BlockSpec((tm, D), lambda i: (i, 0)),
        compiler_params=pltpu.CompilerParams(
            dimension_semantics=("parallel",)),
    )(x, gamma, wgu_bf16, wd_bf16)


def _attention_kernel(q_ref, k_ref, v_ref, o_ref, *,
                      num_heads, num_kv, head_dim, scale):
    # q: [1, S, H*hd], k/v: [1, S, KV*hd], o: [1, S, H*hd] (lane-dense = D wide)
    rep = num_heads // num_kv
    for h in range(num_heads):                      # static unroll, GQA via slicing
        kv = h // rep                               # repeat_interleave semantics
        qh = q_ref[0, :, h * head_dim:(h + 1) * head_dim]
        kh = k_ref[0, :, kv * head_dim:(kv + 1) * head_dim]
        vh = v_ref[0, :, kv * head_dim:(kv + 1) * head_dim]
        s = jnp.dot(qh.astype(jnp.bfloat16), kh.astype(jnp.bfloat16).T,
                    preferred_element_type=jnp.float32) * scale     # [S, S] f32
        s = s - jnp.max(s, axis=-1, keepdims=True)
        p = jnp.exp(s)
        p = p * pl.reciprocal(jnp.sum(p, axis=-1, keepdims=True), approx=True)
        o_ref[0, :, h * head_dim:(h + 1) * head_dim] = jnp.dot(
            p.astype(jnp.bfloat16), vh.astype(jnp.bfloat16),
            preferred_element_type=jnp.float32)


def attention(q, k, v, num_heads, num_kv, head_dim):
    """q [B, S, H*hd], k/v [B, S, KV*hd] -> [B, S, H*hd]  (mask=None path)."""
    B, S, Dq = q.shape
    Dkv = k.shape[-1]
    scale = 1.0 / math.sqrt(head_dim)
    return pl.pallas_call(
        functools.partial(_attention_kernel, num_heads=num_heads,
                          num_kv=num_kv, head_dim=head_dim, scale=scale),
        out_shape=jax.ShapeDtypeStruct((B, S, Dq), jnp.float32),
        grid=(B,),
        in_specs=[
            pl.BlockSpec((1, S, Dq), lambda b: (b, 0, 0)),
            pl.BlockSpec((1, S, Dkv), lambda b: (b, 0, 0)),
            pl.BlockSpec((1, S, Dkv), lambda b: (b, 0, 0)),
        ],
        out_specs=pl.BlockSpec((1, S, Dq), lambda b: (b, 0, 0)),
        compiler_params=pltpu.CompilerParams(
            dimension_semantics=("parallel",)),
    )(q, k, v)


# ----------------------------------------------------------------------------
# Plain-JAX glue: RoPE (matches the PyTorch module's interleaved slicing exactly)
# ----------------------------------------------------------------------------
def make_rope_tables(seq_len, head_dim, base):
    inv_freq = 1.0 / (base ** (jnp.arange(0, head_dim, 2, dtype=jnp.float32) / head_dim))
    position = jnp.arange(seq_len, dtype=jnp.float32)
    sincos = position[:, None] * inv_freq[None, :]                  # [S, hd/2]
    emb = jnp.concatenate([jnp.sin(sincos), jnp.cos(sincos)], -1)   # [S, hd]
    # NOTE: reference slices the *concatenated* (sin, cos) vector:
    cos_t = emb[:, 1::2]                                            # [S, hd/2]
    sin_t = emb[:, ::2]                                             # [S, hd/2]
    return sin_t, cos_t


def apply_rotary(x, sin_t, cos_t):
    # x: [B, S, Hx, hd]; sin_t/cos_t: [S, hd/2]
    cos = cos_t[None, :, None, :]
    sin = sin_t[None, :, None, :]
    x_even = x[..., ::2]
    x_odd = x[..., 1::2]
    return jnp.concatenate(
        [x_even * cos - x_odd * sin, x_even * sin + x_odd * cos], axis=-1
    )


# ----------------------------------------------------------------------------
# Parameter init (mirrors _init_weights) + one-time weight preparation
# ----------------------------------------------------------------------------
def init_params(key, cfg):
    mc = cfg["model"]["model_config"]
    std = cfg["model"]["init_method"]["std"]
    D = mc["hidden_size"]
    I = mc["intermediate_size"]
    H = mc["num_attention_heads"]
    KV = mc["num_key_value_heads"]
    hd = D // H
    V = mc["vocab_size"]
    L = mc["num_hidden_layers"]

    def normal(k, shape):
        return std * jax.random.normal(k, shape, dtype=jnp.float32)

    keys = iter(jax.random.split(key, 2 + L * 7))
    params = {
        "embed_tokens": normal(next(keys), (V, D)),
        "lm_head": normal(next(keys), (V, D)),        # PyTorch [out, in]
        "final_norm": jnp.ones((D,), jnp.float32),
        "layers": [],
    }
    for _ in range(L):
        params["layers"].append({
            "q_proj": normal(next(keys), (D, D)),
            "k_proj": normal(next(keys), (KV * hd, D)),
            "v_proj": normal(next(keys), (KV * hd, D)),
            "o_proj": normal(next(keys), (D, D)),
            "gate_proj": normal(next(keys), (I, D)),
            "up_proj": normal(next(keys), (I, D)),
            "down_proj": normal(next(keys), (D, I)),
            "input_layernorm": jnp.ones((D,), jnp.float32),
            "post_attention_layernorm": jnp.ones((D,), jnp.float32),
        })
    return params


def prepare_weights(params):
    """One-time (outside the forward): pre-transpose to [in, out], fuse QKV and
    gate/up, and cast matmul operands to bf16 (f32 accumulation in-kernel)."""
    D = params["layers"][0]["q_proj"].shape[0]
    prepped = {
        "embed_tokens": params["embed_tokens"],
        "final_norm": params["final_norm"].reshape(1, D),
        "lm_head_t": params["lm_head"].T.astype(jnp.bfloat16),       # [D, V]
        "layers": [],
    }
    for layer in params["layers"]:
        wqkv = jnp.concatenate(
            [layer["q_proj"].T, layer["k_proj"].T, layer["v_proj"].T], axis=1
        ).astype(jnp.bfloat16)                                        # [D, D+2*KV*hd]
        wgu = jnp.concatenate(
            [layer["gate_proj"].T, layer["up_proj"].T], axis=1
        ).astype(jnp.bfloat16)                                        # [D, 2I]
        prepped["layers"].append({
            "wqkv": wqkv,
            "wo": layer["o_proj"].T.astype(jnp.bfloat16),             # [D, D]
            "wgu": wgu,
            "wd": layer["down_proj"].T.astype(jnp.bfloat16),          # [I, D]
            "input_layernorm": layer["input_layernorm"].reshape(1, D),
            "post_attention_layernorm":
                layer["post_attention_layernorm"].reshape(1, D),
        })
    return prepped


# ----------------------------------------------------------------------------
# Forward pass
# ----------------------------------------------------------------------------
def llama_forward(weights, input_ids, cfg):
    mc = cfg["model"]["model_config"]
    D = mc["hidden_size"]
    H = mc["num_attention_heads"]
    KV = mc["num_key_value_heads"]
    hd = D // H
    I = mc["intermediate_size"]
    eps = mc["rms_norm_eps"]
    base = mc["rope_theta"]
    Dkv = KV * hd

    B, S = input_ids.shape
    M = B * S

    # embedding gather (glue)
    h = jnp.take(weights["embed_tokens"], input_ids, axis=0).reshape(M, D)

    sin_t, cos_t = make_rope_tables(S, hd, base)

    for layer in weights["layers"]:
        # --- attention block: fused RMSNorm + QKV projection (one kernel) ---
        qkv = rmsnorm_matmul(h, layer["input_layernorm"], layer["wqkv"], eps)
        q = qkv[:, :D].reshape(B, S, H, hd)
        k = qkv[:, D:D + Dkv].reshape(B, S, KV, hd)
        v = qkv[:, D + Dkv:].reshape(B, S, KV, hd)

        # RoPE in glue (interleaved slicing identical to the reference)
        q = apply_rotary(q, sin_t, cos_t).reshape(B, S, D)
        k = apply_rotary(k, sin_t, cos_t).reshape(B, S, Dkv)
        v = v.reshape(B, S, Dkv)

        # attention: no jnp.repeat (GQA inside kernel), lane-dense [B, S, D] out
        attn = attention(q, k, v, H, KV, hd)

        # fused o_proj + residual add
        h = matmul_residual(attn.reshape(M, D), layer["wo"], h)

        # --- MLP block: fused RMSNorm + SwiGLU + residual (one kernel) ---
        h = mlp_block(h, layer["post_attention_layernorm"],
                      layer["wgu"], layer["wd"], eps, I)

    # fused final RMSNorm + lm_head, tiled over the vocab dimension
    logits = rmsnorm_matmul(h, weights["final_norm"], weights["lm_head_t"], eps)
    V = weights["lm_head_t"].shape[1]
    return logits.reshape(B, S, V)


# ----------------------------------------------------------------------------
# Main
# ----------------------------------------------------------------------------
if __name__ == "__main__":
    key = jax.random.PRNGKey(0)
    pkey, dkey = jax.random.split(key)

    params = init_params(pkey, CONFIG)
    weights = prepare_weights(params)

    B, S = 2, 16
    vocab = CONFIG["model"]["model_config"]["vocab_size"]
    input_ids = jax.random.randint(dkey, (B, S), 0, vocab, dtype=jnp.int32)

    fwd = jax.jit(functools.partial(llama_forward, cfg=CONFIG))
    logits = fwd(weights, input_ids)
    logits = jax.block_until_ready(logits)

    assert logits.shape == (B, S, vocab)
    assert bool(jnp.all(jnp.isfinite(logits)))
    print("KERNEL_OK")
</pallas_src>

<mosaic_0001>
module attributes {stable_mosaic.version = 11 : i64} {
  func.func @_rmsnorm_matmul_kernel(%arg0: i32, %arg1: i32, %arg2: memref<32x128xf32, #tpu.memory_space<vmem>>, %arg3: memref<1x128xf32, #tpu.memory_space<vmem>>, %arg4: memref<128x256xbf16, #tpu.memory_space<vmem>>, %arg5: memref<32x256xf32, #tpu.memory_space<vmem>>) attributes {dimension_semantics = [#tpu.dimension_semantics<parallel>, #tpu.dimension_semantics<parallel>], iteration_bounds = array<i64: 1, 1>, scalar_prefetch = 0 : i64, scratch_operands = 0 : i64, tpu.core_type = #tpu.core_type<tc>, window_params = [{transform_indices = @transform_0, window_bounds = array<i64: 32, 128>}, {pipeline_mode = #tpu.pipeline_mode<synchronous>, transform_indices = @transform_1, window_bounds = array<i64: 1, 128>}, {transform_indices = @transform_2, window_bounds = array<i64: 128, 256>}, {transform_indices = @transform_3, window_bounds = array<i64: 32, 256>}]} {
    %c0 = arith.constant 0 : index
    %c0_0 = arith.constant 0 : index
    %0 = vector.load %arg2[%c0, %c0_0] : memref<32x128xf32, #tpu.memory_space<vmem>>, vector<32x128xf32>
    %1 = arith.mulf %0, %0 : vector<32x128xf32>
    %cst = arith.constant dense<0.000000e+00> : vector<32xf32>
    %2 = vector.multi_reduction <add>, %1, %cst [1] : vector<32x128xf32> to vector<32xf32>
    %3 = vector.shape_cast %2 : vector<32xf32> to vector<32x1xf32>
    %cst_1 = arith.constant 1.280000e+02 : f32
    %4 = vector.broadcast %cst_1 : f32 to vector<32x1xf32>
    %5 = arith.divf %3, %4 : vector<32x1xf32>
    %cst_2 = arith.constant 9.99999974E-6 : f32
    %6 = vector.broadcast %cst_2 : f32 to vector<32x1xf32>
    %7 = arith.addf %5, %6 : vector<32x1xf32>
    %8 = math.rsqrt %7 : vector<32x1xf32>
    %9 = vector.broadcast %8 : vector<32x1xf32> to vector<32x128xf32>
    %10 = arith.mulf %0, %9 : vector<32x128xf32>
    %c0_3 = arith.constant 0 : index
    %c0_4 = arith.constant 0 : index
    %11 = vector.load %arg3[%c0_3, %c0_4] : memref<1x128xf32, #tpu.memory_space<vmem>>, vector<1x128xf32>
    %12 = vector.broadcast %11 : vector<1x128xf32> to vector<32x128xf32>
    %13 = arith.mulf %10, %12 : vector<32x128xf32>
    %14 = arith.truncf %13 : vector<32x128xf32> to vector<32x128xbf16>
    %c0_5 = arith.constant 0 : index
    %c0_6 = arith.constant 0 : index
    %15 = vector.load %arg4[%c0_5, %c0_6] : memref<128x256xbf16, #tpu.memory_space<vmem>>, vector<128x256xbf16>
    %cst_7 = arith.constant dense<0.000000e+00> : vector<32x256xf32>
    %16 = tpu.matmul %14, %15, %cst_7 {dimension_numbers = #tpu.dot_dimension_numbers<[1], [0], [0], [1], [0, 0, 1, 1], [], []>} : vector<32x128xbf16>, vector<128x256xbf16>, vector<32x256xf32> -> vector<32x256xf32>
    %c0_8 = arith.constant 0 : index
    %c0_9 = arith.constant 0 : index
    %17 = vector.load %arg5[%c0_8, %c0_9] : memref<32x256xf32, #tpu.memory_space<vmem>>, vector<32x256xf32>
    tpu.vector_store %arg5[%c0_8, %c0_9], %16 {strides = array<i32>} : memref<32x256xf32, #tpu.memory_space<vmem>>, vector<32x256xf32>,
    return
  }
  func.func @transform_0(%arg0: i32, %arg1: i32) -> (i32, i32) {
    %c0_i32 = arith.constant 0 : i32
    %c0_i32_0 = arith.constant 0 : i32
    return %arg0, %c0_i32 : i32, i32
  }
  func.func @transform_1(%arg0: i32, %arg1: i32) -> (i32, i32) {
    %c0_i32 = arith.constant 0 : i32
    %c0_i32_0 = arith.constant 0 : i32
    %c0_i32_1 = arith.constant 0 : i32
    return %c0_i32, %c0_i32_0 : i32, i32
  }
  func.func @transform_2(%arg0: i32, %arg1: i32) -> (i32, i32) {
    %c0_i32 = arith.constant 0 : i32
    %c0_i32_0 = arith.constant 0 : i32
    return %c0_i32, %arg1 : i32, i32
  }
  func.func @transform_3(%arg0: i32, %arg1: i32) -> (i32, i32) {
    %c0_i32 = arith.constant 0 : i32
    return %arg0, %arg1 : i32, i32
  }
}

module attributes {stable_mosaic.version = 11 : i64} {
  func.func @_attention_kernel(%arg0: i32, %arg1: memref<1x16x128xf32, #tpu.memory_space<vmem>>, %arg2: memref<1x16x64xf32, #tpu.memory_space<vmem>>, %arg3: memref<1x16x64xf32, #tpu.memory_space<vmem>>, %arg4: memref<1x16x128xf32, #tpu.memory_space<vmem>>) attributes {dimension_semantics = [#tpu.dimension_semantics<parallel>], iteration_bounds = array<i64: 2>, scalar_prefetch = 0 : i64, scratch_operands = 0 : i64, tpu.core_type = #tpu.core_type<tc>, window_params = [{transform_indices = @transform_0, window_bounds = array<i64: 1, 16, 128>}, {transform_indices = @transform_1, window_bounds = array<i64: 1, 16, 64>}, {transform_indices = @transform_2, window_bounds = array<i64: 1, 16, 64>}, {transform_indices = @transform_3, window_bounds = array<i64: 1, 16, 128>}]} {
    %c0 = arith.constant 0 : index
    %c0_0 = arith.constant 0 : index
    %c0_1 = arith.constant 0 : index
    %0 = vector.load %arg1[%c0, %c0_0, %c0_1] : memref<1x16x128xf32, #tpu.memory_space<vmem>>, vector<1x16x32xf32>
    %1 = vector.shape_cast %0 : vector<1x16x32xf32> to vector<16x32xf32>
    %c0_2 = arith.constant 0 : index
    %c0_3 = arith.constant 0 : index
    %c0_4 = arith.constant 0 : index
    %2 = vector.load %arg2[%c0_2, %c0_3, %c0_4] : memref<1x16x64xf32, #tpu.memory_space<vmem>>, vector<1x16x32xf32>
    %3 = vector.shape_cast %2 : vector<1x16x32xf32> to vector<16x32xf32>
    %c0_5 = arith.constant 0 : index
    %c0_6 = arith.constant 0 : index
    %c0_7 = arith.constant 0 : index
    %4 = vector.load %arg3[%c0_5, %c0_6, %c0_7] : memref<1x16x64xf32, #tpu.memory_space<vmem>>, vector<1x16x32xf32>
    %5 = vector.shape_cast %4 : vector<1x16x32xf32> to vector<16x32xf32>
    %6 = arith.truncf %1 : vector<16x32xf32> to vector<16x32xbf16>
    %7 = arith.truncf %3 : vector<16x32xf32> to vector<16x32xbf16>
    %8 = tpu.transpose %7, [1, 0] : vector<16x32xbf16> -> vector<32x16xbf16>
    %cst = arith.constant dense<0.000000e+00> : vector<16x16xf32>
    %9 = tpu.matmul %6, %8, %cst {dimension_numbers = #tpu.dot_dimension_numbers<[1], [0], [0], [1], [0, 0, 1, 1], [], []>} : vector<16x32xbf16>, vector<32x16xbf16>, vector<16x16xf32> -> vector<16x16xf32>
    %cst_8 = arith.constant 0.176776692 : f32
    %10 = vector.broadcast %cst_8 : f32 to vector<16x16xf32>
    %11 = arith.mulf %9, %10 : vector<16x16xf32>
    %cst_9 = arith.constant dense<0xFF800000> : vector<16xf32>
    %12 = vector.multi_reduction <maximumf>, %11, %cst_9 [1] : vector<16x16xf32> to vector<16xf32>
    %13 = vector.shape_cast %12 : vector<16xf32> to vector<16x1xf32>
    %14 = vector.broadcast %13 : vector<16x1xf32> to vector<16x16xf32>
    %15 = arith.subf %11, %14 : vector<16x16xf32>
    %16 = math.exp %15 : vector<16x16xf32>
    %cst_10 = arith.constant dense<0.000000e+00> : vector<16xf32>
    %17 = vector.multi_reduction <add>, %16, %cst_10 [1] : vector<16x16xf32> to vector<16xf32>
    %18 = vector.shape_cast %17 : vector<16xf32> to vector<16x1xf32>
    %19 = tpu.reciprocal %18 {approx = true} : vector<16x1xf32> -> vector<16x1xf32>
    %20 = vector.broadcast %19 : vector<16x1xf32> to vector<16x16xf32>
    %21 = arith.mulf %16, %20 : vector<16x16xf32>
    %22 = arith.truncf %21 : vector<16x16xf32> to vector<16x16xbf16>
    %23 = arith.truncf %5 : vector<16x32xf32> to vector<16x32xbf16>
    %cst_11 = arith.constant dense<0.000000e+00> : vector<16x32xf32>
    %24 = tpu.matmul %22, %23, %cst_11 {dimension_numbers = #tpu.dot_dimension_numbers<[1], [0], [0], [1], [0, 0, 1, 1], [], []>} : vector<16x16xbf16>, vector<16x32xbf16>, vector<16x32xf32> -> vector<16x32xf32>
    %c0_12 = arith.constant 0 : index
    %c0_13 = arith.constant 0 : index
    %c0_14 = arith.constant 0 : index
    %25 = vector.load %arg4[%c0_12, %c0_13, %c0_14] : memref<1x16x128xf32, #tpu.memory_space<vmem>>, vector<1x16x32xf32>
    %26 = vector.shape_cast %25 : vector<1x16x32xf32> to vector<16x32xf32>
    %27 = vector.shape_cast %24 : vector<16x32xf32> to vector<1x16x32xf32>
    tpu.vector_store %arg4[%c0_12, %c0_13, %c0_14], %27 {strides = array<i32>} : memref<1x16x128xf32, #tpu.memory_space<vmem>>, vector<1x16x32xf32>,
    %c0_15 = arith.constant 0 : index
    %c0_16 = arith.constant 0 : index
    %c32 = arith.constant 32 : index
    %28 = vector.load %arg1[%c0_15, %c0_16, %c32] : memref<1x16x128xf32, #tpu.memory_space<vmem>>, vector<1x16x32xf32>
    %29 = vector.shape_cast %28 : vector<1x16x32xf32> to vector<16x32xf32>
    %c0_17 = arith.constant 0 : index
    %c0_18 = arith.constant 0 : index
    %c0_19 = arith.constant 0 : index
    %30 = vector.load %arg2[%c0_17, %c0_18, %c0_19] : memref<1x16x64xf32, #tpu.memory_space<vmem>>, vector<1x16x32xf32>
    %31 = vector.shape_cast %30 : vector<1x16x32xf32> to vector<16x32xf32>
    %c0_20 = arith.constant 0 : index
    %c0_21 = arith.constant 0 : index
    %c0_22 = arith.constant 0 : index
    %32 = vector.load %arg3[%c0_20, %c0_21, %c0_22] : memref<1x16x64xf32, #tpu.memory_space<vmem>>, vector<1x16x32xf32>
    %33 = vector.shape_cast %32 : vector<1x16x32xf32> to vector<16x32xf32>
    %34 = arith.truncf %29 : vector<16x32xf32> to vector<16x32xbf16>
    %35 = arith.truncf %31 : vector<16x32xf32> to vector<16x32xbf16>
    %36 = tpu.transpose %35, [1, 0] : vector<16x32xbf16> -> vector<32x16xbf16>
    %cst_23 = arith.constant dense<0.000000e+00> : vector<16x16xf32>
    %37 = tpu.matmul %34, %36, %cst_23 {dimension_numbers = #tpu.dot_dimension_numbers<[1], [0], [0], [1], [0, 0, 1, 1], [], []>} : vector<16x32xbf16>, vector<32x16xbf16>, vector<16x16xf32> -> vector<16x16xf32>
    %cst_24 = arith.constant 0.176776692 : f32
    %38 = vector.broadcast %cst_24 : f32 to vector<16x16xf32>
    %39 = arith.mulf %37, %38 : vector<16x16xf32>
    %cst_25 = arith.constant dense<0xFF800000> : vector<16xf32>
    %40 = vector.multi_reduction <maximumf>, %39, %cst_25 [1] : vector<16x16xf32> to vector<16xf32>
    %41 = vector.shape_cast %40 : vector<16xf32> to vector<16x1xf32>
    %42 = vector.broadcast %41 : vector<16x1xf32> to vector<16x16xf32>
    %43 = arith.subf %39, %42 : vector<16x16xf32>
    %44 = math.exp %43 : vector<16x16xf32>
    %cst_26 = arith.constant dense<0.000000e+00> : vector<16xf32>
    %45 = vector.multi_reduction <add>, %44, %cst_26 [1] : vector<16x16xf32> to vector<16xf32>
    %46 = vector.shape_cast %45 : vector<16xf32> to vector<16x1xf32>
    %47 = tpu.reciprocal %46 {approx = true} : vector<16x1xf32> -> vector<16x1xf32>
    %48 = vector.broadcast %47 : vector<16x1xf32> to vector<16x16xf32>
    %49 = arith.mulf %44, %48 : vector<16x16xf32>
    %50 = arith.truncf %49 : vector<16x16xf32> to vector<16x16xbf16>
    %51 = arith.truncf %33 : vector<16x32xf32> to vector<16x32xbf16>
    %cst_27 = arith.constant dense<0.000000e+00> : vector<16x32xf32>
    %52 = tpu.matmul %50, %51, %cst_27 {dimension_numbers = #tpu.dot_dimension_numbers<[1], [0], [0], [1], [0, 0, 1, 1], [], []>} : vector<16x16xbf16>, vector<16x32xbf16>, vector<16x32xf32> -> vector<16x32xf32>
    %c0_28 = arith.constant 0 : index
    %c0_29 = arith.constant 0 : index
    %c32_30 = arith.constant 32 : index
    %53 = vector.load %arg4[%c0_28, %c0_29, %c32_30] : memref<1x16x128xf32, #tpu.memory_space<vmem>>, vector<1x16x32xf32>
    %54 = vector.shape_cast %53 : vector<1x16x32xf32> to vector<16x32xf32>
    %55 = vector.shape_cast %52 : vector<16x32xf32> to vector<1x16x32xf32>
    tpu.vector_store %arg4[%c0_28, %c0_29, %c32_30], %55 {strides = array<i32>} : memref<1x16x128xf32, #tpu.memory_space<vmem>>, vector<1x16x32xf32>,
    %c0_31 = arith.constant 0 : index
    %c0_32 = arith.constant 0 : index
    %c64 = arith.constant 64 : index
    %56 = vector.load %arg1[%c0_31, %c0_32, %c64] : memref<1x16x128xf32, #tpu.memory_space<vmem>>, vector<1x16x32xf32>
    %57 = vector.shape_cast %56 : vector<1x16x32xf32> to vector<16x32xf32>
    %c0_33 = arith.constant 0 : index
    %c0_34 = arith.constant 0 : index
    %c32_35 = arith.constant 32 : index
    %58 = vector.load %arg2[%c0_33, %c0_34, %c32_35] : memref<1x16x64xf32, #tpu.memory_space<vmem>>, vector<1x16x32xf32>
    %59 = vector.shape_cast %58 : vector<1x16x32xf32> to vector<16x32xf32>
    %c0_36 = arith.constant 0 : index
    %c0_37 = arith.constant 0 : index
    %c32_38 = arith.constant 32 : index
    %60 = vector.load %arg3[%c0_36, %c0_37, %c32_38] : memref<1x16x64xf32, #tpu.memory_space<vmem>>, vector<1x16x32xf32>
    %61 = vector.shape_cast %60 : vector<1x16x32xf32> to vector<16x32xf32>
    %62 = arith.truncf %57 : vector<16x32xf32> to vector<16x32xbf16>
    %63 = arith.truncf %59 : vector<16x32xf32> to vector<16x32xbf16>
    %64 = tpu.transpose %63, [1, 0] : vector<16x32xbf16> -> vector<32x16xbf16>
    %cst_39 = arith.constant dense<0.000000e+00> : vector<16x16xf32>
    %65 = tpu.matmul %62, %64, %cst_39 {dimension_numbers = #tpu.dot_dimension_numbers<[1], [0], [0], [1], [0, 0, 1, 1], [], []>} : vector<16x32xbf16>, vector<32x16xbf16>, vector<16x16xf32> -> vector<16x16xf32>
    %cst_40 = arith.constant 0.176776692 : f32
    %66 = vector.broadcast %cst_40 : f32 to vector<16x16xf32>
    %67 = arith.mulf %65, %66 : vector<16x16xf32>
    %cst_41 = arith.constant dense<0xFF800000> : vector<16xf32>
    %68 = vector.multi_reduction <maximumf>, %67, %cst_41 [1] : vector<16x16xf32> to vector<16xf32>
    %69 = vector.shape_cast %68 : vector<16xf32> to vector<16x1xf32>
    %70 = vector.broadcast %69 : vector<16x1xf32> to vector<16x16xf32>
    %71 = arith.subf %67, %70 : vector<16x16xf32>
    %72 = math.exp %71 : vector<16x16xf32>
    %cst_42 = arith.constant dense<0.000000e+00> : vector<16xf32>
    %73 = vector.multi_reduction <add>, %72, %cst_42 [1] : vector<16x16xf32> to vector<16xf32>
    %74 = vector.shape_cast %73 : vector<16xf32> to vector<16x1xf32>
    %75 = tpu.reciprocal %74 {approx = true} : vector<16x1xf32> -> vector<16x1xf32>
    %76 = vector.broadcast %75 : vector<16x1xf32> to vector<16x16xf32>
    %77 = arith.mulf %72, %76 : vector<16x16xf32>
    %78 = arith.truncf %77 : vector<16x16xf32> to vector<16x16xbf16>
    %79 = arith.truncf %61 : vector<16x32xf32> to vector<16x32xbf16>
    %cst_43 = arith.constant dense<0.000000e+00> : vector<16x32xf32>
    %80 = tpu.matmul %78, %79, %cst_43 {dimension_numbers = #tpu.dot_dimension_numbers<[1], [0], [0], [1], [0, 0, 1, 1], [], []>} : vector<16x16xbf16>, vector<16x32xbf16>, vector<16x32xf32> -> vector<16x32xf32>
    %c0_44 = arith.constant 0 : index
    %c0_45 = arith.constant 0 : index
    %c64_46 = arith.constant 64 : index
    %81 = vector.load %arg4[%c0_44, %c0_45, %c64_46] : memref<1x16x128xf32, #tpu.memory_space<vmem>>, vector<1x16x32xf32>
    %82 = vector.shape_cast %81 : vector<1x16x32xf32> to vector<16x32xf32>
    %83 = vector.shape_cast %80 : vector<16x32xf32> to vector<1x16x32xf32>
    tpu.vector_store %arg4[%c0_44, %c0_45, %c64_46], %83 {strides = array<i32>} : memref<1x16x128xf32, #tpu.memory_space<vmem>>, vector<1x16x32xf32>,
    %c0_47 = arith.constant 0 : index
    %c0_48 = arith.constant 0 : index
    %c96 = arith.constant 96 : index
    %84 = vector.load %arg1[%c0_47, %c0_48, %c96] : memref<1x16x128xf32, #tpu.memory_space<vmem>>, vector<1x16x32xf32>
    %85 = vector.shape_cast %84 : vector<1x16x32xf32> to vector<16x32xf32>
    %c0_49 = arith.constant 0 : index
    %c0_50 = arith.constant 0 : index
    %c32_51 = arith.constant 32 : index
    %86 = vector.load %arg2[%c0_49, %c0_50, %c32_51] : memref<1x16x64xf32, #tpu.memory_space<vmem>>, vector<1x16x32xf32>
    %87 = vector.shape_cast %86 : vector<1x16x32xf32> to vector<16x32xf32>
    %c0_52 = arith.constant 0 : index
    %c0_53 = arith.constant 0 : index
    %c32_54 = arith.constant 32 : index
    %88 = vector.load %arg3[%c0_52, %c0_53, %c32_54] : memref<1x16x64xf32, #tpu.memory_space<vmem>>, vector<1x16x32xf32>
    %89 = vector.shape_cast %88 : vector<1x16x32xf32> to vector<16x32xf32>
    %90 = arith.truncf %85 : vector<16x32xf32> to vector<16x32xbf16>
    %91 = arith.truncf %87 : vector<16x32xf32> to vector<16x32xbf16>
    %92 = tpu.transpose %91, [1, 0] : vector<16x32xbf16> -> vector<32x16xbf16>
    %cst_55 = arith.constant dense<0.000000e+00> : vector<16x16xf32>
    %93 = tpu.matmul %90, %92, %cst_55 {dimension_numbers = #tpu.dot_dimension_numbers<[1], [0], [0], [1], [0, 0, 1, 1], [], []>} : vector<16x32xbf16>, vector<32x16xbf16>, vector<16x16xf32> -> vector<16x16xf32>
    %cst_56 = arith.constant 0.176776692 : f32
    %94 = vector.broadcast %cst_56 : f32 to vector<16x16xf32>
    %95 = arith.mulf %93, %94 : vector<16x16xf32>
    %cst_57 = arith.constant dense<0xFF800000> : vector<16xf32>
    %96 = vector.multi_reduction <maximumf>, %95, %cst_57 [1] : vector<16x16xf32> to vector<16xf32>
    %97 = vector.shape_cast %96 : vector<16xf32> to vector<16x1xf32>
    %98 = vector.broadcast %97 : vector<16x1xf32> to vector<16x16xf32>
    %99 = arith.subf %95, %98 : vector<16x16xf32>
    %100 = math.exp %99 : vector<16x16xf32>
    %cst_58 = arith.constant dense<0.000000e+00> : vector<16xf32>
    %101 = vector.multi_reduction <add>, %100, %cst_58 [1] : vector<16x16xf32> to vector<16xf32>
    %102 = vector.shape_cast %101 : vector<16xf32> to vector<16x1xf32>
    %103 = tpu.reciprocal %102 {approx = true} : vector<16x1xf32> -> vector<16x1xf32>
    %104 = vector.broadcast %103 : vector<16x1xf32> to vector<16x16xf32>
    %105 = arith.mulf %100, %104 : vector<16x16xf32>
    %106 = arith.truncf %105 : vector<16x16xf32> to vector<16x16xbf16>
    %107 = arith.truncf %89 : vector<16x32xf32> to vector<16x32xbf16>
    %cst_59 = arith.constant dense<0.000000e+00> : vector<16x32xf32>
    %108 = tpu.matmul %106, %107, %cst_59 {dimension_numbers = #tpu.dot_dimension_numbers<[1], [0], [0], [1], [0, 0, 1, 1], [], []>} : vector<16x16xbf16>, vector<16x32xbf16>, vector<16x32xf32> -> vector<16x32xf32>
    %c0_60 = arith.constant 0 : index
    %c0_61 = arith.constant 0 : index
    %c96_62 = arith.constant 96 : index
    %109 = vector.load %arg4[%c0_60, %c0_61, %c96_62] : memref<1x16x128xf32, #tpu.memory_space<vmem>>, vector<1x16x32xf32>
    %110 = vector.shape_cast %109 : vector<1x16x32xf32> to vector<16x32xf32>
    %111 = vector.shape_cast %108 : vector<16x32xf32> to vector<1x16x32xf32>
    tpu.vector_store %arg4[%c0_60, %c0_61, %c96_62], %111 {strides = array<i32>} : memref<1x16x128xf32, #tpu.memory_space<vmem>>, vector<1x16x32xf32>,
    return
  }
  func.func @transform_0(%arg0: i32) -> (i32, i32, i32) {
    %c0_i32 = arith.constant 0 : i32
    %c0_i32_0 = arith.constant 0 : i32
    %c0_i32_1 = arith.constant 0 : i32
    return %arg0, %c0_i32, %c0_i32_0 : i32, i32, i32
  }
  func.func @transform_1(%arg0: i32) -> (i32, i32, i32) {
    %c0_i32 = arith.constant 0 : i32
    %c0_i32_0 = arith.constant 0 : i32
    %c0_i32_1 = arith.constant 0 : i32
    return %arg0, %c0_i32, %c0_i32_0 : i32, i32, i32
  }
  func.func @transform_2(%arg0: i32) -> (i32, i32, i32) {
    %c0_i32 = arith.constant 0 : i32
    %c0_i32_0 = arith.constant 0 : i32
    %c0_i32_1 = arith.constant 0 : i32
    return %arg0, %c0_i32, %c0_i32_0 : i32, i32, i32
  }
  func.func @transform_3(%arg0: i32) -> (i32, i32, i32) {
    %c0_i32 = arith.constant 0 : i32
    %c0_i32_0 = arith.constant 0 : i32
    %c0_i32_1 = arith.constant 0 : i32
    return %arg0, %c0_i32, %c0_i32_0 : i32, i32, i32
  }
}

module attributes {stable_mosaic.version = 11 : i64} {
  func.func @_matmul_residual_kernel(%arg0: i32, %arg1: i32, %arg2: memref<32x128xf32, #tpu.memory_space<vmem>>, %arg3: memref<128x128xbf16, #tpu.memory_space<vmem>>, %arg4: memref<32x128xf32, #tpu.memory_space<vmem>>, %arg5: memref<32x128xf32, #tpu.memory_space<vmem>>) attributes {dimension_semantics = [#tpu.dimension_semantics<parallel>, #tpu.dimension_semantics<parallel>], iteration_bounds = array<i64: 1, 1>, scalar_prefetch = 0 : i64, scratch_operands = 0 : i64, tpu.core_type = #tpu.core_type<tc>, window_params = [{transform_indices = @transform_0, window_bounds = array<i64: 32, 128>}, {transform_indices = @transform_1, window_bounds = array<i64: 128, 128>}, {transform_indices = @transform_2, window_bounds = array<i64: 32, 128>}, {transform_indices = @transform_3, window_bounds = array<i64: 32, 128>}]} {
    %c0 = arith.constant 0 : index
    %c0_0 = arith.constant 0 : index
    %0 = vector.load %arg4[%c0, %c0_0] : memref<32x128xf32, #tpu.memory_space<vmem>>, vector<32x128xf32>
    %c0_1 = arith.constant 0 : index
    %c0_2 = arith.constant 0 : index
    %1 = vector.load %arg2[%c0_1, %c0_2] : memref<32x128xf32, #tpu.memory_space<vmem>>, vector<32x128xf32>
    %2 = arith.truncf %1 : vector<32x128xf32> to vector<32x128xbf16>
    %c0_3 = arith.constant 0 : index
    %c0_4 = arith.constant 0 : index
    %3 = vector.load %arg3[%c0_3, %c0_4] : memref<128x128xbf16, #tpu.memory_space<vmem>>, vector<128x128xbf16>
    %cst = arith.constant dense<0.000000e+00> : vector<32x128xf32>
    %4 = tpu.matmul %2, %3, %cst {dimension_numbers = #tpu.dot_dimension_numbers<[1], [0], [0], [1], [0, 0, 1, 1], [], []>} : vector<32x128xbf16>, vector<128x128xbf16>, vector<32x128xf32> -> vector<32x128xf32>
    %5 = arith.addf %0, %4 : vector<32x128xf32>
    %c0_5 = arith.constant 0 : index
    %c0_6 = arith.constant 0 : index
    %6 = vector.load %arg5[%c0_5, %c0_6] : memref<32x128xf32, #tpu.memory_space<vmem>>, vector<32x128xf32>
    tpu.vector_store %arg5[%c0_5, %c0_6], %5 {strides = array<i32>} : memref<32x128xf32, #tpu.memory_space<vmem>>, vector<32x128xf32>,
    return
  }
  func.func @transform_0(%arg0: i32, %arg1: i32) -> (i32, i32) {
    %c0_i32 = arith.constant 0 : i32
    %c0_i32_0 = arith.constant 0 : i32
    return %arg0, %c0_i32 : i32, i32
  }
  func.func @transform_1(%arg0: i32, %arg1: i32) -> (i32, i32) {
    %c0_i32 = arith.constant 0 : i32
    %c0_i32_0 = arith.constant 0 : i32
    return %c0_i32, %arg1 : i32, i32
  }
  func.func @transform_2(%arg0: i32, %arg1: i32) -> (i32, i32) {
    %c0_i32 = arith.constant 0 : i32
    return %arg0, %arg1 : i32, i32
  }
  func.func @transform_3(%arg0: i32, %arg1: i32) -> (i32, i32) {
    %c0_i32 = arith.constant 0 : i32
    return %arg0, %arg1 : i32, i32
  }
}

module attributes {stable_mosaic.version = 11 : i64} {
  func.func @_mlp_kernel(%arg0: i32, %arg1: memref<32x128xf32, #tpu.memory_space<vmem>>, %arg2: memref<1x128xf32, #tpu.memory_space<vmem>>, %arg3: memref<128x512xbf16, #tpu.memory_space<vmem>>, %arg4: memref<256x128xbf16, #tpu.memory_space<vmem>>, %arg5: memref<32x128xf32, #tpu.memory_space<vmem>>) attributes {dimension_semantics = [#tpu.dimension_semantics<parallel>], iteration_bounds = array<i64: 1>, scalar_prefetch = 0 : i64, scratch_operands = 0 : i64, tpu.core_type = #tpu.core_type<tc>, window_params = [{transform_indices = @transform_0, window_bounds = array<i64: 32, 128>}, {pipeline_mode = #tpu.pipeline_mode<synchronous>, transform_indices = @transform_1, window_bounds = array<i64: 1, 128>}, {pipeline_mode = #tpu.pipeline_mode<synchronous>, transform_indices = @transform_2, window_bounds = array<i64: 128, 512>}, {pipeline_mode = #tpu.pipeline_mode<synchronous>, transform_indices = @transform_3, window_bounds = array<i64: 256, 128>}, {transform_indices = @transform_4, window_bounds = array<i64: 32, 128>}]} {
    %c0 = arith.constant 0 : index
    %c0_0 = arith.constant 0 : index
    %0 = vector.load %arg1[%c0, %c0_0] : memref<32x128xf32, #tpu.memory_space<vmem>>, vector<32x128xf32>
    %1 = arith.mulf %0, %0 : vector<32x128xf32>
    %cst = arith.constant dense<0.000000e+00> : vector<32xf32>
    %2 = vector.multi_reduction <add>, %1, %cst [1] : vector<32x128xf32> to vector<32xf32>
    %3 = vector.shape_cast %2 : vector<32xf32> to vector<32x1xf32>
    %cst_1 = arith.constant 1.280000e+02 : f32
    %4 = vector.broadcast %cst_1 : f32 to vector<32x1xf32>
    %5 = arith.divf %3, %4 : vector<32x1xf32>
    %cst_2 = arith.constant 9.99999974E-6 : f32
    %6 = vector.broadcast %cst_2 : f32 to vector<32x1xf32>
    %7 = arith.addf %5, %6 : vector<32x1xf32>
    %8 = math.rsqrt %7 : vector<32x1xf32>
    %9 = vector.broadcast %8 : vector<32x1xf32> to vector<32x128xf32>
    %10 = arith.mulf %0, %9 : vector<32x128xf32>
    %c0_3 = arith.constant 0 : index
    %c0_4 = arith.constant 0 : index
    %11 = vector.load %arg2[%c0_3, %c0_4] : memref<1x128xf32, #tpu.memory_space<vmem>>, vector<1x128xf32>
    %12 = vector.broadcast %11 : vector<1x128xf32> to vector<32x128xf32>
    %13 = arith.mulf %10, %12 : vector<32x128xf32>
    %14 = arith.truncf %13 : vector<32x128xf32> to vector<32x128xbf16>
    %c0_5 = arith.constant 0 : index
    %c0_6 = arith.constant 0 : index
    %15 = vector.load %arg3[%c0_5, %c0_6] : memref<128x512xbf16, #tpu.memory_space<vmem>>, vector<128x512xbf16>
    %cst_7 = arith.constant dense<0.000000e+00> : vector<32x512xf32>
    %16 = tpu.matmul %14, %15, %cst_7 {dimension_numbers = #tpu.dot_dimension_numbers<[1], [0], [0], [1], [0, 0, 1, 1], [], []>} : vector<32x128xbf16>, vector<128x512xbf16>, vector<32x512xf32> -> vector<32x512xf32>
    %17 = vector.extract_strided_slice %16 {offsets = [0, 0], sizes = [32, 256], strides = [1, 1]} : vector<32x512xf32> to vector<32x256xf32>
    %18 = vector.extract_strided_slice %16 {offsets = [0, 256], sizes = [32, 256], strides = [1, 1]} : vector<32x512xf32> to vector<32x256xf32>
    %19 = arith.negf %17 : vector<32x256xf32>
    %20 = math.exp %19 : vector<32x256xf32>
    %cst_8 = arith.constant 1.000000e+00 : f32
    %21 = vector.broadcast %cst_8 : f32 to vector<32x256xf32>
    %22 = arith.addf %21, %20 : vector<32x256xf32>
    %23 = arith.divf %21, %22 : vector<32x256xf32>
    %24 = arith.mulf %17, %23 : vector<32x256xf32>
    %25 = arith.mulf %24, %18 : vector<32x256xf32>
    %26 = arith.truncf %25 : vector<32x256xf32> to vector<32x256xbf16>
    %c0_9 = arith.constant 0 : index
    %c0_10 = arith.constant 0 : index
    %27 = vector.load %arg4[%c0_9, %c0_10] : memref<256x128xbf16, #tpu.memory_space<vmem>>, vector<256x128xbf16>
    %cst_11 = arith.constant dense<0.000000e+00> : vector<32x128xf32>
    %28 = tpu.matmul %26, %27, %cst_11 {dimension_numbers = #tpu.dot_dimension_numbers<[1], [0], [0], [1], [0, 0, 1, 1], [], []>} : vector<32x256xbf16>, vector<256x128xbf16>, vector<32x128xf32> -> vector<32x128xf32>
    %29 = arith.addf %0, %28 : vector<32x128xf32>
    %c0_12 = arith.constant 0 : index
    %c0_13 = arith.constant 0 : index
    %30 = vector.load %arg5[%c0_12, %c0_13] : memref<32x128xf32, #tpu.memory_space<vmem>>, vector<32x128xf32>
    tpu.vector_store %arg5[%c0_12, %c0_13], %29 {strides = array<i32>} : memref<32x128xf32, #tpu.memory_space<vmem>>, vector<32x128xf32>,
    return
  }
  func.func @transform_0(%arg0: i32) -> (i32, i32) {
    %c0_i32 = arith.constant 0 : i32
    %c0_i32_0 = arith.constant 0 : i32
    return %arg0, %c0_i32 : i32, i32
  }
  func.func @transform_1(%arg0: i32) -> (i32, i32) {
    %c0_i32 = arith.constant 0 : i32
    %c0_i32_0 = arith.constant 0 : i32
    %c0_i32_1 = arith.constant 0 : i32
    return %c0_i32, %c0_i32_0 : i32, i32
  }
  func.func @transform_2(%arg0: i32) -> (i32, i32) {
    %c0_i32 = arith.constant 0 : i32
    %c0_i32_0 = arith.constant 0 : i32
    %c0_i32_1 = arith.constant 0 : i32
    return %c0_i32, %c0_i32_0 : i32, i32
  }
  func.func @transform_3(%arg0: i32) -> (i32, i32) {
    %c0_i32 = arith.constant 0 : i32
    %c0_i32_0 = arith.constant 0 : i32
    %c0_i32_1 = arith.constant 0 : i32
    return %c0_i32, %c0_i32_0 : i32, i32
  }
  func.func @transform_4(%arg0: i32) -> (i32, i32) {
    %c0_i32 = arith.constant 0 : i32
    %c0_i32_0 = arith.constant 0 : i32
    return %arg0, %c0_i32 : i32, i32
  }
}

module attributes {stable_mosaic.version = 11 : i64} {
  func.func @_rmsnorm_matmul_kernel(%arg0: i32, %arg1: i32, %arg2: memref<32x128xf32, #tpu.memory_space<vmem>>, %arg3: memref<1x128xf32, #tpu.memory_space<vmem>>, %arg4: memref<128x256xbf16, #tpu.memory_space<vmem>>, %arg5: memref<32x256xf32, #tpu.memory_space<vmem>>) attributes {dimension_semantics = [#tpu.dimension_semantics<parallel>, #tpu.dimension_semantics<parallel>], iteration_bounds = array<i64: 1, 2>, scalar_prefetch = 0 : i64, scratch_operands = 0 : i64, tpu.core_type = #tpu.core_type<tc>, window_params = [{transform_indices = @transform_0, window_bounds = array<i64: 32, 128>}, {pipeline_mode = #tpu.pipeline_mode<synchronous>, transform_indices = @transform_1, window_bounds = array<i64: 1, 128>}, {transform_indices = @transform_2, window_bounds = array<i64: 128, 256>}, {transform_indices = @transform_3, window_bounds = array<i64: 32, 256>}]} {
    %c0 = arith.constant 0 : index
    %c0_0 = arith.constant 0 : index
    %0 = vector.load %arg2[%c0, %c0_0] : memref<32x128xf32, #tpu.memory_space<vmem>>, vector<32x128xf32>
    %1 = arith.mulf %0, %0 : vector<32x128xf32>
    %cst = arith.constant dense<0.000000e+00> : vector<32xf32>
    %2 = vector.multi_reduction <add>, %1, %cst [1] : vector<32x128xf32> to vector<32xf32>
    %3 = vector.shape_cast %2 : vector<32xf32> to vector<32x1xf32>
    %cst_1 = arith.constant 1.280000e+02 : f32
    %4 = vector.broadcast %cst_1 : f32 to vector<32x1xf32>
    %5 = arith.divf %3, %4 : vector<32x1xf32>
    %cst_2 = arith.constant 9.99999974E-6 : f32
    %6 = vector.broadcast %cst_2 : f32 to vector<32x1xf32>
    %7 = arith.addf %5, %6 : vector<32x1xf32>
    %8 = math.rsqrt %7 : vector<32x1xf32>
    %9 = vector.broadcast %8 : vector<32x1xf32> to vector<32x128xf32>
    %10 = arith.mulf %0, %9 : vector<32x128xf32>
    %c0_3 = arith.constant 0 : index
    %c0_4 = arith.constant 0 : index
    %11 = vector.load %arg3[%c0_3, %c0_4] : memref<1x128xf32, #tpu.memory_space<vmem>>, vector<1x128xf32>
    %12 = vector.broadcast %11 : vector<1x128xf32> to vector<32x128xf32>
    %13 = arith.mulf %10, %12 : vector<32x128xf32>
    %14 = arith.truncf %13 : vector<32x128xf32> to vector<32x128xbf16>
    %c0_5 = arith.constant 0 : index
    %c0_6 = arith.constant 0 : index
    %15 = vector.load %arg4[%c0_5, %c0_6] : memref<128x256xbf16, #tpu.memory_space<vmem>>, vector<128x256xbf16>
    %cst_7 = arith.constant dense<0.000000e+00> : vector<32x256xf32>
    %16 = tpu.matmul %14, %15, %cst_7 {dimension_numbers = #tpu.dot_dimension_numbers<[1], [0], [0], [1], [0, 0, 1, 1], [], []>} : vector<32x128xbf16>, vector<128x256xbf16>, vector<32x256xf32> -> vector<32x256xf32>
    %c0_8 = arith.constant 0 : index
    %c0_9 = arith.constant 0 : index
    %17 = vector.load %arg5[%c0_8, %c0_9] : memref<32x256xf32, #tpu.memory_space<vmem>>, vector<32x256xf32>
    tpu.vector_store %arg5[%c0_8, %c0_9], %16 {strides = array<i32>} : memref<32x256xf32, #tpu.memory_space<vmem>>, vector<32x256xf32>,
    return
  }
  func.func @transform_0(%arg0: i32, %arg1: i32) -> (i32, i32) {
    %c0_i32 = arith.constant 0 : i32
    %c0_i32_0 = arith.constant 0 : i32
    return %arg0, %c0_i32 : i32, i32
  }
  func.func @transform_1(%arg0: i32, %arg1: i32) -> (i32, i32) {
    %c0_i32 = arith.constant 0 : i32
    %c0_i32_0 = arith.constant 0 : i32
    %c0_i32_1 = arith.constant 0 : i32
    return %c0_i32, %c0_i32_0 : i32, i32
  }
  func.func @transform_2(%arg0: i32, %arg1: i32) -> (i32, i32) {
    %c0_i32 = arith.constant 0 : i32
    %c0_i32_0 = arith.constant 0 : i32
    return %c0_i32, %arg1 : i32, i32
  }
  func.func @transform_3(%arg0: i32, %arg1: i32) -> (i32, i32) {
    %c0_i32 = arith.constant 0 : i32
    return %arg0, %arg1 : i32, i32
  }
}

</mosaic_0001>

<bundles_post_ra>
// kernel: llama_forward.9
= control target key start
LH: loop header
LB: loop body
LE: loop exit
PB: predicated region body
PF: predicated region fallthrough
CT: control target
= control target key end

     0   :  { %v288_v19 = vmov 0   ;;  %s416_s0 = inlined_call_operand.vmem [shape: f32[32,128], index: 0, kind: input, shape index: {}]   ;;  %s417_s2 = inlined_call_operand.vmem [shape: bf16[128,256], index: 2, kind: input, shape index: {}]   ;;  %s418_s1 = inlined_call_operand.vmem [shape: f32[1,128], index: 1, kind: input, shape index: {}]   ;;  %s419_s3 = inlined_call_operand.vmem [shape: f32[32,256], index: 3, kind: output, shape index: {}]  }
   0x1   :  { %v312_v0 = vld [vmem:[%s416_s0 + $0x10] sm:$0xff]  ;;  %v317_v1 = vld [vmem:[%s416_s0] sm:$0xff]  ;;  %v322_v2 = vld [vmem:[%s416_s0 + $0x18] sm:$0xff]  ;;  %189 = vmatprep.mubr.bf16.mxu0 %v288_v19  ;;  %199 = vmatprep.mubr.bf16.mxu1 %v288_v19 }
   0x2   :  { %v21_v3 = vmul.f32 %v312_v0, %v312_v0  ;;  %v19_v4 = vmul.f32 %v317_v1, %v317_v1  ;;  %v331_v5 = vld [vmem:[%s416_s0 + $0x8] sm:$0xff]  ;;  %v256_v6 = vld [vmem:[%s417_s2 + $0x74] ss:$8 sps:$4 sm:$0xff]   ;;  %v258_v7 = vld [vmem:[%s417_s2 + $0x70] ss:$8 sps:$4 sm:$0xff]   ;;  %v22_v8 = vmul.f32 %v322_v2, %v322_v2 }
   0x3   :  { %v20_v9 = vmul.f32 %v331_v5, %v331_v5  ;;  %157 = vmatprep.subr.bf16.mxu0 %v256_v6  ;;  %239 = vmatprep.subr.bf16.mxu1 %v256_v6  ;;  %v259_v10 = vld [vmem:[%s417_s2 + $0x64] ss:$8 sps:$4 sm:$0xff]   ;;  %v261_v11 = vld [vmem:[%s417_s2 + $0x60] ss:$8 sps:$4 sm:$0xff]   ;;  %v262_v12 = vld [vmem:[%s417_s2 + $0x54] ss:$8 sps:$4 sm:$0xff]  }
   0x4   :  { %27 = vadd.xlane.f32.xlu1 %v21_v3  ;;  %23 = vadd.xlane.f32.xlu0 %v19_v4  ;;  %v264_v13 = vld [vmem:[%s417_s2 + $0x50] ss:$8 sps:$4 sm:$0xff]   ;;  %v265_v14 = vld [vmem:[%s417_s2 + $0x44] ss:$8 sps:$4 sm:$0xff]   ;;  %v267_v15 = vld [vmem:[%s417_s2 + $0x40] ss:$8 sps:$4 sm:$0xff]  }
   0x5   :  { %158 = vmatpush1.bf16.msra.mxu0 %v258_v7  ;;  %247 = vmatpush1.bf16.msra.mxu1 %v258_v7  ;;  %v268_v16 = vld [vmem:[%s417_s2 + $0x34] ss:$8 sps:$4 sm:$0xff]   ;;  %v270_v17 = vld [vmem:[%s417_s2 + $0x30] ss:$8 sps:$4 sm:$0xff]   ;;  %v271_v18 = vld [vmem:[%s417_s2 + $0x24] ss:$8 sps:$4 sm:$0xff]  }
   0x6   :  { %159 = vmatprep.subr.bf16.mxu0 %v259_v10  ;;  %240 = vmatprep.subr.bf16.mxu1 %v259_v10  ;;  %v273_v20 = vld [vmem:[%s417_s2 + $0x20] ss:$8 sps:$4 sm:$0xff]   ;;  %v274_v21 = vld [vmem:[%s417_s2 + $0x14] ss:$8 sps:$4 sm:$0xff]   ;;  %v276_v22 = vld [vmem:[%s417_s2 + $0x10] ss:$8 sps:$4 sm:$0xff]  }
   0x7   :  { %v277_v23 = vld [vmem:[%s417_s2 + $0x4] ss:$8 sps:$4 sm:$0xff]   ;;  %v279_v24 = vld [vmem:[%s417_s2] ss:$8 sps:$4 sm:$0xff]  }
   0x8   :  { %29 = vadd.xlane.f32.xlu1 %v22_v8  ;;  %25 = vadd.xlane.f32.xlu0 %v20_v9  ;;  %v222_v42 = vld [vmem:[%s418_s1] ss:$0 sm:$0xff] }
   0x9   :  { %160 = vmatpush1.bf16.msra.mxu0 %v261_v11  ;;  %248 = vmatpush1.bf16.msra.mxu1 %v261_v11 }
   0xa   :  { %161 = vmatprep.subr.bf16.mxu0 %v262_v12  ;;  %241 = vmatprep.subr.bf16.mxu1 %v262_v12 }
   0xd   :  { %162 = vmatpush1.bf16.msra.mxu0 %v264_v13  ;;  %249 = vmatpush1.bf16.msra.mxu1 %v264_v13 }
   0xe   :  { %163 = vmatprep.subr.bf16.mxu0 %v265_v14  ;;  %242 = vmatprep.subr.bf16.mxu1 %v265_v14 }
  0x11   :  { %164 = vmatpush1.bf16.msra.mxu0 %v267_v15  ;;  %250 = vmatpush1.bf16.msra.mxu1 %v267_v15 }
  0x12   :  { %165 = vmatprep.subr.bf16.mxu0 %v268_v16  ;;  %243 = vmatprep.subr.bf16.mxu1 %v268_v16 }
  0x15   :  { %166 = vmatpush1.bf16.msra.mxu0 %v270_v17  ;;  %251 = vmatpush1.bf16.msra.mxu1 %v270_v17 }
  0x16   :  { %167 = vmatprep.subr.bf16.mxu0 %v271_v18  ;;  %244 = vmatprep.subr.bf16.mxu1 %v271_v18 }
  0x19   :  { %168 = vmatpush1.bf16.msra.mxu0 %v273_v20  ;;  %252 = vmatpush1.bf16.msra.mxu1 %v273_v20 }
  0x1a   :  { %169 = vmatprep.subr.bf16.mxu0 %v274_v21  ;;  %245 = vmatprep.subr.bf16.mxu1 %v274_v21 }
  0x1d   :  { %170 = vmatpush1.bf16.msra.mxu0 %v276_v22  ;;  %253 = vmatpush1.bf16.msra.mxu1 %v276_v22 }
  0x1e   :  { %171 = vmatprep.subr.bf16.mxu0 %v277_v23  ;;  %246 = vmatprep.subr.bf16.mxu1 %v277_v23 }
  0x21   :  { %172 = vmatpush1.bf16.msra.mxu0 %v279_v24  ;;  %254 = vmatpush1.bf16.msra.mxu1 %v279_v24 }
  0x8d   :  { %v28_v25 = vpop.xlane.xlu1 %27  ;;  %v24_v26 = vpop.xlane.xlu0 %23 }
  0x8e   :  { %v34_v27 = vmul.f32 0.0078125, %v28_v25  ;;  %v32_v28 = vmul.f32 0.0078125, %v24_v26 }
  0x90   :  { %v38_v29 = vadd.f32 1e-05, %v34_v27  ;;  %v36_v30 = vadd.f32 1e-05, %v32_v28 }
  0x91   :  { %v30_v31 = vpop.xlane.xlu1 %29  ;;  %v26_v32 = vpop.xlane.xlu0 %25 }
  0x92   :  { %280 = vrsqrt.f32 %v38_v29  ;;  %v35_v33 = vmul.f32 0.0078125, %v30_v31  ;;  %v33_v34 = vmul.f32 0.0078125, %v26_v32 }
  0x93   :  { %282 = vrsqrt.f32 %v36_v30 }
  0x94   :  { %v39_v35 = vadd.f32 1e-05, %v35_v33  ;;  %v37_v36 = vadd.f32 1e-05, %v33_v34 }
  0x96   :  { %284 = vrsqrt.f32 %v39_v35 }
  0x97   :  { %286 = vrsqrt.f32 %v37_v36 }
  0x9f   :  { %v281_v37 = vpop.eup %280 }
  0xa0   :  { %v283_v38 = vpop.eup %282  ;;  %v46_v39 = vmul.f32 %v281_v37, %v312_v0 }
  0xa1   :  { %v44_v41 = vmul.f32 %v283_v38, %v317_v1 }
  0xa2   :  { %v57_v46 = vmul.f32 %v222_v42, %v46_v39 }
  0xa3   :  { %v285_v40 = vpop.eup %284  ;;  %v55_v48 = vmul.f32 %v222_v42, %v44_v41 }
  0xa4   :  { %v287_v43 = vpop.eup %286  ;;  %v47_v44 = vmul.f32 %v285_v40, %v322_v2 }
  0xa5   :  { %v45_v45 = vmul.f32 %v287_v43, %v331_v5 }
  0xa6   :  { %v58_v47 = vmul.f32 %v222_v42, %v47_v44 }
  0xa7   :  { %v56_v49 = vmul.f32 %v222_v42, %v45_v45 }
  0xa8   :  { %v60_v50 = vpack.c.bf16 %v58_v47, %v57_v46 }
  0xa9   :  { %v59_v51 = vpack.c.bf16 %v56_v49, %v55_v48 }
  0xaa   :  { %200 = vmatmul.mubr.bf16.vlgmr.msra.gmra.mxu1 %v60_v50 }
  0xab   :  { %190 = vmatmul.mubr.bf16.vlgmr.msra.gmra.mxu0 %v59_v51 }
 0x16a   :  { %v201_v52 = vpop.f32.mrf.mxu1 }
 0x16b   :  { %v191_v53 = vpop.f32.mrf.mxu0  ;;  %214 = vst [vmem:[%s419_s3 + $0x20] sm:$0xff] %v201_v52 }
 0x16c   :  { %210 = vst [vmem:[%s419_s3] sm:$0xff] %v191_v53  ;;  %v203_v54 = vpop.f32.mrf.mxu1 }
 0x16d   :  { %v193_v55 = vpop.f32.mrf.mxu0  ;;  %215 = vst [vmem:[%s419_s3 + $0x28] sm:$0xff] %v203_v54 }
 0x16e   :  { %211 = vst [vmem:[%s419_s3 + $0x8] sm:$0xff] %v193_v55  ;;  %v205_v56 = vpop.f32.mrf.mxu1 }
 0x16f   :  { %v195_v57 = vpop.f32.mrf.mxu0  ;;  %216 = vst [vmem:[%s419_s3 + $0x30] sm:$0xff] %v205_v56 }
 0x170   :  { %212 = vst [vmem:[%s419_s3 + $0x10] sm:$0xff] %v195_v57  ;;  %v207_v58 = vpop.f32.mrf.mxu1 }
 0x171   :  { %v197_v59 = vpop.f32.mrf.mxu0  ;;  %217 = vst [vmem:[%s419_s3 + $0x38] sm:$0xff] %v207_v58 }
 0x172   :  { %213 = vst [vmem:[%s419_s3 + $0x18] sm:$0xff] %v197_v59 }

// kernel: llama_forward.11
= control target key start
LH: loop header
LB: loop body
LE: loop exit
PB: predicated region body
PF: predicated region fallthrough
CT: control target
= control target key end

     0   :  { %s276_s1 = inlined_call_operand.vmem [shape: bf16[128,128], index: 1, kind: input, shape index: {}]   ;;  %s277_s0 = inlined_call_operand.vmem [shape: f32[32,128], index: 0, kind: input, shape index: {}]   ;;  %s278_s2 = inlined_call_operand.vmem [shape: f32[32,128], index: 2, kind: input, shape index: {}]   ;;  %s279_s3 = inlined_call_operand.vmem [shape: f32[32,128], index: 3, kind: output, shape index: {}]  }
   0x1   :  { %v188_v0 = vld [vmem:[%s276_s1 + $0x38] sm:$0xff]   ;;  %v189_v1 = vld [vmem:[%s276_s1 + $0x30] sm:$0xff]   ;;  %v190_v2 = vld [vmem:[%s276_s1 + $0x28] sm:$0xff]  }
   0x2   :  { %168 = vmatprep.subr.bf16.mxu0 %v188_v0  ;;  %v191_v3 = vld [vmem:[%s276_s1 + $0x20] sm:$0xff]   ;;  %v20_v5 = vld [vmem:[%s277_s0 + $0x8] sm:$0xff]  ;;  %v192_v7 = vld [vmem:[%s276_s1 + $0x18] sm:$0xff]  }
   0x3   :  { %169 = vmatpush3.bf16.msra.mxu0 %v188_v0  ;;  %v19_v4 = vld [vmem:[%s277_s0] sm:$0xff]  ;;  %v193_v8 = vld [vmem:[%s276_s1 + $0x10] sm:$0xff]   ;;  %v194_v9 = vld [vmem:[%s276_s1 + $0x8] sm:$0xff]  }
   0x4   :  { %170 = vmatprep.subr.bf16.mxu0 %v189_v1  ;;  %v23_v6 = vpack.c.bf16 %v20_v5, %v19_v4  ;;  %v195_v10 = vld [vmem:[%s276_s1] sm:$0xff]   ;;  %v21_v11 = vld [vmem:[%s277_s0 + $0x10] sm:$0xff]  ;;  %v22_v12 = vld [vmem:[%s277_s0 + $0x18] sm:$0xff] }
   0x5   :  { %v24_v13 = vpack.c.bf16 %v22_v12, %v21_v11  ;;  %v17_v14 = vld [vmem:[%s278_s2 + $0x10] sm:$0xff]  ;;  %v15_v16 = vld [vmem:[%s278_s2] sm:$0xff]  ;;  %v18_v19 = vld [vmem:[%s278_s2 + $0x18] sm:$0xff] }
   0x6   :  { %184 = vmatprep.mubr.bf16.mxu0 %v23_v6  ;;  %v16_v22 = vld [vmem:[%s278_s2 + $0x8] sm:$0xff] }
   0x7   :  { %171 = vmatpush3.bf16.msra.mxu0 %v189_v1 }
   0x8   :  { %172 = vmatprep.subr.bf16.mxu0 %v190_v2 }
   0xb   :  { %173 = vmatpush3.bf16.msra.mxu0 %v190_v2 }
   0xc   :  { %174 = vmatprep.subr.bf16.mxu0 %v191_v3 }
   0xf   :  { %175 = vmatpush3.bf16.msra.mxu0 %v191_v3 }
  0x10   :  { %176 = vmatprep.subr.bf16.mxu0 %v192_v7 }
  0x13   :  { %177 = vmatpush3.bf16.msra.mxu0 %v192_v7 }
  0x14   :  { %178 = vmatprep.subr.bf16.mxu0 %v193_v8 }
  0x17   :  { %179 = vmatpush3.bf16.msra.mxu0 %v193_v8 }
  0x18   :  { %180 = vmatprep.subr.bf16.mxu0 %v194_v9 }
  0x1b   :  { %181 = vmatpush3.bf16.msra.mxu0 %v194_v9 }
  0x1c   :  { %182 = vmatprep.subr.bf16.mxu0 %v195_v10 }
  0x1f   :  { %183 = vmatpush3.bf16.msra.mxu0 %v195_v10 }
  0x22   :  { %185 = vmatmul.mubr.bf16.vlgmr.msra.gmra.mxu0 %v24_v13 }
  0xe2   :  { %v186_v15 = vpop.f32.mrf.mxu0 }
  0xe3   :  { %v140_v17 = vadd.f32 %v186_v15, %v17_v14 }
  0xe4   :  { %v123_v18 = vpop.f32.mrf.mxu0 }
  0xe5   :  { %144 = vst [vmem:[%s279_s3 + $0x10] sm:$0xff] %v140_v17  ;;  %v138_v20 = vadd.f32 %v123_v18, %v15_v16 }
  0xe6   :  { %v187_v21 = vpop.f32.mrf.mxu0 }
  0xe7   :  { %142 = vst [vmem:[%s279_s3] sm:$0xff] %v138_v20  ;;  %v141_v23 = vadd.f32 %v187_v21, %v18_v19 }
  0xe8   :  { %v126_v24 = vpop.f32.mrf.mxu0 }
  0xe9   :  { %145 = vst [vmem:[%s279_s3 + $0x18] sm:$0xff] %v141_v23  ;;  %v139_v25 = vadd.f32 %v126_v24, %v16_v22 }
  0xeb   :  { %143 = vst [vmem:[%s279_s3 + $0x8] sm:$0xff] %v139_v25 }

// kernel: llama_forward.10
= control target key start
LH: loop header
LB: loop body
LE: loop exit
PB: predicated region body
PF: predicated region fallthrough
CT: control target
= control target key end

     0   :  { %s1020_s12 = smov 0   ;;  %s1131_s0 = inlined_call_operand.vmem [shape: f32[2,16,128], index: 0, kind: input, shape index: {}]   ;;  %s1132_s1 = inlined_call_operand.vmem [shape: f32[2,16,64], index: 1, kind: input, shape index: {}]   ;;  %s1133_s2 = inlined_call_operand.vmem [shape: f32[2,16,64], index: 2, kind: input, shape index: {}]   ;;  %s1134_s3 = inlined_call_operand.vmem [shape: f32[2,16,128], index: 3, kind: output, shape index: {}]  }
   0x1 LB: > { %s851_s13 = sadd.s32 4294967295, %s993_s12   ;;  %p855_p0 = scmp.ge.s32.totalorder %s993_s12, 1  ;;  %s993_s12 = sphi %s1020_s12, %s13_s12  }
   0x2   : > { %p157_p1 = scmp.lt.s32.totalorder %s993_s12, 3 }
   0x4   : > { %p158_p2 = pnand %p855_p0, %p157_p1 }
   0x5   : > { %p191_p3 = scmp.lt.s32.totalorder (!%p158_p2), %s851_s13, 1  ;;  %s997_s21 = smov (!%p158_p2), 96  }
   0x6   : > { %161 = sbr.rel (%p158_p2) target bundleno = 1388 (0x56c), region = 32  ;;  %s998_s22 = smov (!%p158_p2), 32  }
   0x7   : > { %s999_s26 = smov (!%p158_p2), 64  }
   0xb   : > { %v995_v0 = vmov 0.0   ;;  %vm996_vm0 = vmmov 0   ;;  %s1136_s13 = smov (!%p191_p3, %s851_s13), 1  ;;  %vm220_vm1 = vcmask 261120   ;;  %vm270_vm2 = vcmask 130048  }
   0xc   : > { %894 = vmatprep.subr.bf16.mxu0 %v995_v0  ;;  %896 = vmatprep.mubr.msk.bf16.mxu0 %vm996_vm0, %v995_v0  ;;  %s1034_s14 = sshll.u32 %s1136_s13, 4  ;;  %vm477_vm3 = vcmask 523520   ;;  %vm623_vm4 = vcmask 785920   ;;  %vm769_vm5 = vcmask 1048320  }
   0xd   : > { %900 = vmatprep.subr.bf16.mxu1 %v995_v0  ;;  %902 = vmatprep.mubr.msk.bf16.mxu1 %vm996_vm0, %v995_v0  ;;  %s200_s17 = scalar_lea.vmem %s1132_s1, %s1034_s14  ;;  %s195_s20 = scalar_lea.vmem %s1131_s0, %s1034_s14 }
   0xe   : > { %v214_v1 = vld [vmem:[%s200_s17] sm:$0xff]  ;;  %v215_v2 = vld [vmem:[%s200_s17 + $0x8] sm:$0xff]  ;;  %s205_s25 = scalar_lea.vmem %s1133_s2, %s1034_s14  ;;  %s1086_s29 = scalar_lea.vmem %s1134_s3, %s1034_s14 }
   0xf   : > { %v219_v3 = vpack.c.bf16 %v215_v2, %v214_v1  ;;  %v212_v5 = vld [vmem:[%s195_s20] sm:$0xff]  ;;  %v213_v6 = vld [vmem:[%s195_s20 + $0x8] sm:$0xff] }
  0x10   : > { %v218_v7 = vpack.c.bf16 %v213_v6, %v212_v5  ;;  %v216_v26 = vld [vmem:[%s205_s25] sm:$0xff]  ;;  %v217_v27 = vld [vmem:[%s205_s25 + $0x8] sm:$0xff] }
  0x11   : > { %v225_v4 = vsel %vm220_vm1, %v219_v3, 0  ;;  %v1059_v28 = vpack.c.bf16 %v217_v27, %v216_v26 }
  0x12   : > { %895 = vmatpush3.bf16.xpose.msra.mxu0 %v225_v4 }
  0x13   : > { %912 = vmatprep.subr.bf16.mxu0 %v995_v0  ;;  %901 = vmatpush3.bf16.msra.mxu1 %v1059_v28 }
  0x14   : > { %906 = vmatprep.subr.bf16.mxu1 %v995_v0 }
  0x19   : > { %897 = vmatmul.mubr.msk.bf16.vlgmr.msra.gmra.mxu0 %vm220_vm1, %v218_v7 }
  0x1a   : > { %914 = vmatprep.mubr.msk.bf16.mxu0 %vm996_vm0, %v995_v0  ;;  %913 = vmatpush3.bf16.msra.mxu0 %v1059_v28 }
  0x1b   : > { %924 = vmatprep.subr.bf16.mxu0 %v995_v0 }
  0xd9   : > { %v261_v8 = vpop.f32.mrf.mxu0 }
  0xda   : > { %v268_v9 = vmul.f32 0.17677669, %v261_v8 }
  0xdb   : > { %v898_v10 = vpop.f32.mrf.mxu0 }
  0xdc   : > { %v271_v11 = vsel %vm270_vm2, %v268_v9, -inf }
  0xdd   : > { %272 = vmax.xlane.f32.xlu0 %v271_v11  ;;  %v264_v12 = vpop.f32.mrf.mxu0 }
  0xde   : > { %v269_v13 = vmul.f32 0.17677669, %v264_v12 }
  0xdf   : > { %v899_v14 = vpop.f32.mrf.mxu0 }
  0xe0   : > { %v274_v15 = vsel %vm270_vm2, %v269_v13, -inf }
  0xe1   : > { %275 = vmax.xlane.f32.xlu0 %v274_v15 }
  0xf7   : > { %350 = vrot.lane.b32.xlu0 %v218_v7, %s997_s21 }
  0xfb   : > { %635 = vrot.lane.b32.xlu0 %v218_v7, %s998_s22 }
 0x166   : > { %v273_v16 = vpop.xlane.xlu0 %272 }
 0x167   : > { %v277_v17 = vsub.f32 %v268_v9, %v273_v16 }
 0x169   : > { %v279_v18 = vmul.f32 1.442695, %v277_v17 }
 0x16a   : > { %v276_v19 = vpop.xlane.xlu0 %275 }
 0x16b   : > { %955 = vpow2.f32 %v279_v18  ;;  %v278_v20 = vsub.f32 %v269_v13, %v276_v19 }
 0x16d   : > { %v281_v21 = vmul.f32 1.442695, %v278_v20 }
 0x16e   : > { %v351_v37 = vpop.permute.xlu0 %350 }
 0x16f   : > { %957 = vpow2.f32 %v281_v21 }
 0x172   : > { %v636_v42 = vpop.permute.xlu0 %635 }
 0x178   : > { %v956_v22 = vpop.eup %955 }
 0x179   : > { %v283_v23 = vsel %vm270_vm2, %v956_v22, 0.0 }
 0x17a   : > { %284 = vadd.xlane.f32.xlu1 %v283_v23 }
 0x17c   : > { %v958_v24 = vpop.eup %957 }
 0x17d   : > { %v286_v25 = vsel %vm270_vm2, %v958_v24, 0.0 }
 0x17e   : > { %287 = vadd.xlane.f32.xlu1 %v286_v25 }
 0x18f   : > { %492 = vrot.lane.b32.xlu1 %v219_v3, %s997_s21 }
 0x193   : > { %489 = vrot.lane.b32.xlu1 %v218_v7, %s999_s26 }
 0x197   : > { %638 = vrot.lane.b32.xlu1 %v219_v3, %s997_s21 }
 0x203   : > { %v285_v29 = vpop.xlane.xlu1 %284 }
 0x204   : > { %959 = vrcp.f32 %v285_v29 }
 0x207   : > { %v288_v30 = vpop.xlane.xlu1 %287 }
 0x208   : > { %961 = vrcp.f32 %v288_v30 }
 0x20b   : > { %v493_v36 = vpop.permute.xlu1 %492 }
 0x20c   : > { %v498_v39 = vsel %vm220_vm1, %v493_v36, 0 }
 0x20f   : > { %v490_v38 = vpop.permute.xlu1 %489 }
 0x211   : > { %v960_v31 = vpop.eup %959 }
 0x212   : > { %v291_v33 = vmul.f32 %v960_v31, %v956_v22 }
 0x213   : > { %v639_v40 = vpop.permute.xlu1 %638 }
 0x214   : > { %v644_v41 = vsel %vm220_vm1, %v639_v40, 0 }
 0x215   : > { %v962_v32 = vpop.eup %961 }
 0x216   : > { %v292_v34 = vmul.f32 %v962_v32, %v958_v24 }
 0x218   : > { %v293_v35 = vpack.c.bf16 %v292_v34, %v291_v33 }
 0x21a   : > { %903 = vmatmul.mubr.msk.bf16.vlgmr.msra.gmra.mxu1 %vm270_vm2, %v293_v35 }
 0x21b   : > { %907 = vmatpush3.bf16.xpose.msra.mxu1 %v225_v4  ;;  %908 = vmatprep.mubr.msk.bf16.mxu1 %vm996_vm0, %v995_v0 }
 0x21c   : > { %918 = vmatprep.subr.bf16.mxu1 %v995_v0 }
 0x222   : > { %909 = vmatmul.mubr.msk.bf16.vlgmr.msra.gmra.mxu1 %vm220_vm1, %v351_v37 }
 0x223   : > { %919 = vmatpush3.bf16.xpose.msra.mxu1 %v498_v39  ;;  %920 = vmatprep.mubr.msk.bf16.mxu1 %vm996_vm0, %v995_v0 }
 0x224   : > { %930 = vmatprep.subr.bf16.mxu1 %v995_v0 }
 0x22a   : > { %921 = vmatmul.mubr.msk.bf16.vlgmr.msra.gmra.mxu1 %vm220_vm1, %v490_v38 }
 0x22b   : > { %931 = vmatpush3.bf16.xpose.msra.mxu1 %v644_v41  ;;  %932 = vmatprep.mubr.msk.bf16.mxu1 %vm996_vm0, %v995_v0 }
 0x232   : > { %933 = vmatmul.mubr.msk.bf16.vlgmr.msra.gmra.mxu1 %vm220_vm1, %v636_v42 }
 0x2da   : > { %v332_v43 = vpop.f32.mrf.mxu1 }
 0x2db   : > { %339 = vst.msk [vmem:[%s1086_s29] sm:$0xff] %vm220_vm1, %v332_v43 }
 0x2dc   : > { %v904_v44 = vpop.f32.mrf.mxu1 }
 0x2de   : > { %v335_v45 = vpop.f32.mrf.mxu1 }
 0x2df   : > { %340 = vst.msk [vmem:[%s1086_s29 + $0x8] sm:$0xff] %vm220_vm1, %v335_v45 }
 0x2e0   : > { %v905_v46 = vpop.f32.mrf.mxu1 }
 0x2e2   : > { %v392_v47 = vpop.f32.mrf.mxu1 }
 0x2e3   : > { %v399_v48 = vmul.f32 0.17677669, %v392_v47 }
 0x2e4   : > { %v910_v49 = vpop.f32.mrf.mxu1 }
 0x2e5   : > { %v401_v50 = vsel %vm270_vm2, %v399_v48, -inf }
 0x2e6   : > { %402 = vmax.xlane.f32.xlu1 %v401_v50  ;;  %v395_v51 = vpop.f32.mrf.mxu1 }
 0x2e7   : > { %v400_v52 = vmul.f32 0.17677669, %v395_v51 }
 0x2e8   : > { %v911_v53 = vpop.f32.mrf.mxu1 }
 0x2e9   : > { %v404_v54 = vsel %vm270_vm2, %v400_v52, -inf }
 0x2ea   : > { %405 = vmax.xlane.f32.xlu0 %v404_v54  ;;  %v534_v55 = vpop.f32.mrf.mxu1 }
 0x2eb   : > { %v541_v56 = vmul.f32 0.17677669, %v534_v55 }
 0x2ec   : > { %v922_v57 = vpop.f32.mrf.mxu1 }
 0x2ed   : > { %v543_v58 = vsel %vm270_vm2, %v541_v56, -inf }
 0x2ee   : > { %544 = vmax.xlane.f32.xlu0 %v543_v58  ;;  %v537_v59 = vpop.f32.mrf.mxu1 }
 0x2ef   : > { %v542_v60 = vmul.f32 0.17677669, %v537_v59 }
 0x2f0   : > { %v923_v61 = vpop.f32.mrf.mxu1 }
 0x2f1   : > { %v546_v62 = vsel %vm270_vm2, %v542_v60, -inf }
 0x2f2   : > { %547 = vmax.xlane.f32.xlu0 %v546_v62  ;;  %v680_v63 = vpop.f32.mrf.mxu1 }
 0x2f3   : > { %v687_v1 = vmul.f32 0.17677669, %v680_v63 }
 0x2f4   : > { %v934_v2 = vpop.f32.mrf.mxu1 }
 0x2f5   : > { %v689_v3 = vsel %vm270_vm2, %v687_v1, -inf }
 0x2f6   : > { %690 = vmax.xlane.f32.xlu1 %v689_v3  ;;  %v683_v4 = vpop.f32.mrf.mxu1 }
 0x2f7   : > { %v688_v5 = vmul.f32 0.17677669, %v683_v4 }
 0x2f8   : > { %v935_v6 = vpop.f32.mrf.mxu1 }
 0x2f9   : > { %v692_v7 = vsel %vm270_vm2, %v688_v5, -inf }
 0x2fa   : > { %693 = vmax.xlane.f32.xlu0 %v692_v7 }
 0x36f   : > { %v403_v8 = vpop.xlane.xlu1 %402 }
 0x370   : > { %v407_v9 = vsub.f32 %v399_v48, %v403_v8 }
 0x372   : > { %v409_v10 = vmul.f32 1.442695, %v407_v9 }
 0x373   : > { %v406_v11 = vpop.xlane.xlu0 %405 }
 0x374   : > { %963 = vpow2.f32 %v409_v10  ;;  %v408_v12 = vsub.f32 %v400_v52, %v406_v11 }
 0x376   : > { %v411_v13 = vmul.f32 1.442695, %v408_v12 }
 0x377   : > { %v545_v14 = vpop.xlane.xlu0 %544 }
 0x378   : > { %965 = vpow2.f32 %v411_v13  ;;  %v549_v15 = vsub.f32 %v541_v56, %v545_v14 }
 0x37a   : > { %v551_v16 = vmul.f32 1.442695, %v549_v15 }
 0x37b   : > { %v548_v17 = vpop.xlane.xlu0 %547 }
 0x37c   : > { %967 = vpow2.f32 %v551_v16  ;;  %v550_v18 = vsub.f32 %v542_v60, %v548_v17 }
 0x37e   : > { %v553_v19 = vmul.f32 1.442695, %v550_v18 }
 0x37f   : > { %v691_v20 = vpop.xlane.xlu1 %690 }
 0x380   : > { %969 = vpow2.f32 %v553_v19  ;;  %v695_v21 = vsub.f32 %v687_v1, %v691_v20 }
 0x381   : > { %v964_v22 = vpop.eup %963 }
 0x382   : > { %v697_v23 = vmul.f32 1.442695, %v695_v21  ;;  %v413_v24 = vsel %vm270_vm2, %v964_v22, 0.0 }
 0x383   : > { %414 = vadd.xlane.f32.xlu1 %v413_v24  ;;  %v694_v25 = vpop.xlane.xlu0 %693 }
 0x384   : > { %971 = vpow2.f32 %v697_v23  ;;  %v696_v26 = vsub.f32 %v688_v5, %v694_v25 }
 0x385   : > { %v966_v27 = vpop.eup %965 }
 0x386   : > { %v699_v29 = vmul.f32 1.442695, %v696_v26  ;;  %v416_v30 = vsel %vm270_vm2, %v966_v27, 0.0 }
 0x387   : > { %417 = vadd.xlane.f32.xlu0 %v416_v30 }
 0x388   : > { %973 = vpow2.f32 %v699_v29 }
 0x389   : > { %v968_v31 = vpop.eup %967 }
 0x38a   : > { %v555_v32 = vsel %vm270_vm2, %v968_v31, 0.0 }
 0x38b   : > { %556 = vadd.xlane.f32.xlu1 %v555_v32 }
 0x38d   : > { %v970_v33 = vpop.eup %969 }
 0x38e   : > { %v558_v34 = vsel %vm270_vm2, %v970_v33, 0.0 }
 0x38f   : > { %559 = vadd.xlane.f32.xlu0 %v558_v34 }
 0x391   : > { %v972_v35 = vpop.eup %971 }
 0x392   : > { %v701_v36 = vsel %vm270_vm2, %v972_v35, 0.0 }
 0x393   : > { %702 = vadd.xlane.f32.xlu1 %v701_v36 }
 0x395   : > { %v974_v37 = vpop.eup %973 }
 0x396   : > { %v704_v38 = vsel %vm270_vm2, %v974_v37, 0.0 }
 0x397   : > { %705 = vadd.xlane.f32.xlu0 %v704_v38 }
 0x3a4   : > { %568 = vrot.lane.b32.xlu1 %v1059_v28, %s997_s21 }
 0x3ad   : > { %714 = vrot.lane.b32.xlu0 %v1059_v28, %s997_s21 }
 0x40c   : > { %v415_v39 = vpop.xlane.xlu1 %414 }
 0x40d   : > { %975 = vrcp.f32 %v415_v39 }
 0x410   : > { %v418_v40 = vpop.xlane.xlu0 %417 }
 0x411   : > { %977 = vrcp.f32 %v418_v40 }
 0x414   : > { %v557_v41 = vpop.xlane.xlu1 %556 }
 0x415   : > { %979 = vrcp.f32 %v557_v41 }
 0x418   : > { %v560_v42 = vpop.xlane.xlu0 %559 }
 0x419   : > { %981 = vrcp.f32 %v560_v42 }
 0x41a   : > { %v976_v43 = vpop.eup %975 }
 0x41b   : > { %v421_v46 = vmul.f32 %v976_v43, %v964_v22 }
 0x41c   : > { %v703_v44 = vpop.xlane.xlu1 %702 }
 0x41d   : > { %983 = vrcp.f32 %v703_v44 }
 0x41e   : > { %v978_v45 = vpop.eup %977 }
 0x41f   : > { %v422_v47 = vmul.f32 %v978_v45, %v966_v27 }
 0x420   : > { %v706_v48 = vpop.xlane.xlu0 %705  ;;  %v569_v49 = vpop.permute.xlu1 %568 }
 0x421   : > { %985 = vrcp.f32 %v706_v48  ;;  %v423_v50 = vpack.c.bf16 %v422_v47, %v421_v46 }
 0x422   : > { %v980_v28 = vpop.eup %979 }
 0x423   : > { %915 = vmatmul.mubr.msk.bf16.vlgmr.msra.gmra.mxu0 %vm270_vm2, %v423_v50  ;;  %v563_v52 = vmul.f32 %v980_v28, %v968_v31 }
 0x424   : > { %925 = vmatpush3.bf16.msra.mxu0 %v569_v49  ;;  %926 = vmatprep.mubr.msk.bf16.mxu0 %vm996_vm0, %v995_v0  ;;  %v715_v54 = vpop.permute.xlu0 %714 }
 0x425   : > { %936 = vmatprep.subr.bf16.mxu0 %v995_v0 }
 0x426   : > { %v982_v51 = vpop.eup %981 }
 0x427   : > { %v564_v53 = vmul.f32 %v982_v51, %v970_v33 }
 0x429   : > { %v565_v55 = vpack.c.bf16 %v564_v53, %v563_v52 }
 0x42a   : > { %v984_v56 = vpop.eup %983 }
 0x42b   : > { %927 = vmatmul.mubr.msk.bf16.vlgmr.msra.gmra.mxu0 %vm270_vm2, %v565_v55  ;;  %v709_v58 = vmul.f32 %v984_v56, %v972_v35 }
 0x42c   : > { %937 = vmatpush3.bf16.msra.mxu0 %v715_v54  ;;  %938 = vmatprep.mubr.msk.bf16.mxu0 %vm996_vm0, %v995_v0 }
 0x42e   : > { %v986_v57 = vpop.eup %985 }
 0x42f   : > { %v710_v59 = vmul.f32 %v986_v57, %v974_v37 }
 0x431   : > { %v711_v60 = vpack.c.bf16 %v710_v59, %v709_v58 }
 0x433   : > { %939 = vmatmul.mubr.msk.bf16.vlgmr.msra.gmra.mxu0 %vm270_vm2, %v711_v60 }
 0x4e3   : > { %v462_v61 = vpop.f32.mrf.mxu0 }
 0x4e4   : > { %471 = vrot.lane.b32.xlu1 %v462_v61, %s998_s22 }
 0x4e5   : > { %v916_v62 = vpop.f32.mrf.mxu0 }
 0x4e7   : > { %v465_v63 = vpop.f32.mrf.mxu0 }
 0x4e8   : > { %473 = vrot.lane.b32.xlu1 %v465_v63, %s998_s22 }
 0x4e9   : > { %v917_v1 = vpop.f32.mrf.mxu0 }
 0x4eb   : > { %v608_v2 = vpop.f32.mrf.mxu0 }
 0x4ec   : > { %617 = vrot.lane.b32.xlu1 %v608_v2, %s999_s26 }
 0x4ed   : > { %v928_v0 = vpop.f32.mrf.mxu0 }
 0x4ef   : > { %v611_v3 = vpop.f32.mrf.mxu0 }
 0x4f0   : > { %619 = vrot.lane.b32.xlu0 %v611_v3, %s999_s26 }
 0x4f1   : > { %v929_v4 = vpop.f32.mrf.mxu0 }
 0x4f3   : > { %v754_v5 = vpop.f32.mrf.mxu0 }
 0x4f4   : > { %763 = vrot.lane.b32.xlu1 %v754_v5, %s997_s21 }
 0x4f5   : > { %v940_v6 = vpop.f32.mrf.mxu0 }
 0x4f7   : > { %v757_v7 = vpop.f32.mrf.mxu0 }
 0x4f8   : > { %765 = vrot.lane.b32.xlu0 %v757_v7, %s997_s21 }
 0x4f9   : > { %v941_v8 = vpop.f32.mrf.mxu0 }
 0x556   : > { %v472_v9 = vpop.permute.xlu1 %471 }
 0x557   : > { %478 = vst.msk [vmem:[%s1086_s29] sm:$0xff] %vm477_vm3, %v472_v9 }
 0x55a   : > { %v474_v10 = vpop.permute.xlu1 %473 }
 0x55b   : > { %479 = vst.msk [vmem:[%s1086_s29 + $0x8] sm:$0xff] %vm477_vm3, %v474_v10 }
 0x55e   : > { %v618_v11 = vpop.permute.xlu1 %617 }
 0x55f   : > { %624 = vst.msk [vmem:[%s1086_s29] sm:$0xff] %vm623_vm4, %v618_v11 }
 0x562   : > { %v620_v12 = vpop.permute.xlu0 %619 }
 0x563   : > { %625 = vst.msk [vmem:[%s1086_s29 + $0x8] sm:$0xff] %vm623_vm4, %v620_v12 }
 0x566   : > { %v764_v13 = vpop.permute.xlu1 %763 }
 0x567   : > { %770 = vst.msk [vmem:[%s1086_s29] sm:$0xff] %vm769_vm5, %v764_v13 }
 0x56a   : > { %v766_v14 = vpop.permute.xlu0 %765 }
 0x56b   : > { %771 = vst.msk [vmem:[%s1086_s29 + $0x8] sm:$0xff] %vm769_vm5, %v766_v14 }
 0x56c PF: > { %s13_s12 = sadd.s32 1, %s993_s12  }
 0x56d   : > { %p10_p4 = scmp.ge.s32.totalorder %s13_s12, 4  }
 0x56f   :  { %12 = sbr.rel (!%p10_p4) target bundleno = 1 (0x1), region = 68 }

// kernel: llama_forward.17
= control target key start
LH: loop header
LB: loop body
LE: loop exit
PB: predicated region body
PF: predicated region fallthrough
CT: control target
= control target key end

     0   :  { %8 = vsyncpa [#allocation4], 0  ;;  %s1058_s0 = inlined_call_operand.vmem [shape: f32[32,128], index: 0, kind: input, shape index: {}]   ;;  %s1059_s1 = inlined_call_operand.vmem [shape: f32[1,128], index: 1, kind: input, shape index: {}]   ;;  %s1060_s2 = inlined_call_operand.vmem [shape: bf16[128,512], index: 2, kind: input, shape index: {}]   ;;  %s1061_s3 = inlined_call_operand.hbm [shape: f32[32,512], index: 3, kind: output, shape index: {}]  }
   0x1   :  { %10 = vsyncpa [#allocation4 + $0x1], 0  ;;  %s864_s12 = smov 0   ;;  %s866_s13 = smov 0  }
   0x2   :  { %s868_s14 = smov 0   ;;  %s870_s15 = smov 0  }
   0x3   :  { %s872_s16 = smov 0   ;;  %s874_s17 = smov 0  }
   0x4 LB: > { %s619_s18 = sadd.s32 4294967295, %s837_s17   ;;  %s620_s19 = sadd.s32 4294967294, %s837_s17   ;;  %s837_s17 = sphi %s874_s17, %s16_s17   ;;  %s833_s16 = sphi %s872_s16, %s1068_s16   ;;  %s829_s15 = sphi %s870_s15, %s1067_s15   ;;  %s825_s14 = sphi %s868_s14, %s1066_s14   ;;  %s821_s13 = sphi %s866_s13, %s1065_s13   ;;  %s817_s12 = sphi %s864_s12, %s1064_s12  }
   0x5   : > { %s25_s20 = sadd.s32 1, %s833_s16  ;;  %s82_s21 = sadd.s32 1, %s825_s14 }
   0x6   : > { %p26_p0 = scmp.ge.s32.totalorder %s25_s20, 2  ;;  %p89_p1 = scmp.ne.s32.totalorder %s825_s14, %s821_s13 }
   0x7   : > { %p90_p2 = scmp.eq.s32.totalorder %s837_s17, 0  ;;  %p121_p3 = scmp.eq.s32.totalorder %s619_s18, 1 }
   0x8   : > { %s1070_s20 = smov (%p26_p0, %s25_s20), 0  ;;  %p126_p6 = scmp.ne.s32.totalorder %s821_s13, %s817_s12 }
   0x9   : > { %p91_p4 = por %p90_p2, %p89_p1  ;;  %p903_p5 = por %p121_p3, %p89_p1 }
   0xa   : > { %s79_s23 = ssub.s32 %s833_s16, %s1070_s20  ;;  %p127_p8 = scmp.eq.s32.totalorder %s620_s19, 1 }
   0xb   : > { %p80_p7 = scmp.eq.s32.totalorder %s79_s23, 0  ;;  %p623_p10 = scmp.ge.s32.totalorder %s837_s17, 2 }
   0xc   : > { %p914_p9 = por %p127_p8, %p126_p6 }
   0xd   : > { %s912_s24 = scalar_select %p80_p7, %s825_s14, %s82_s21  }
   0xe   : > { %155 = sbr.rel (%p623_p10) target bundleno = 31 (0x1f), region = 24 }
  0x13   : > { %158 = sbr.rel (!%p91_p4) target bundleno = 31 (0x1f), region = 28  ;;  %s160_s26 = sand.u32 (%p91_p4), 1, %s825_s14  }
  0x14   : > { %s652_s27 = sshll.u32 (%p91_p4), %s833_s16, 3  ;;  %s624_s28 = sshll.u32 (%p91_p4), %s160_s26, 7 }
  0x15   : > { %s926_s4 = scalar_lea.vmem (%p91_p4), %s1060_s2, %s652_s27  ;;  %s162_s5 = scalar_lea.vmem (%p91_p4), [#allocation2], %s624_s28 }
  0x16   : > { %v224_v0 = vld [vmem:[%s926_s4] sm:$0xff] (%p91_p4)  ;;  %v226_v1 = vld [vmem:[%s926_s4 + $0x10] sm:$0xff] (%p91_p4) }
  0x17   : > { %v228_v2 = vld [vmem:[%s926_s4 + $0x20] sm:$0xff] (%p91_p4)  ;;  %225 = vst [vmem:[%s162_s5] sm:$0xff] (%p91_p4), %v224_v0  ;;  %227 = vst [vmem:[%s162_s5 + $0x8] sm:$0xff] (%p91_p4), %v226_v1  ;;  %v230_v3 = vld [vmem:[%s926_s4 + $0x30] sm:$0xff] (%p91_p4) }
  0x18   : > { %229 = vst [vmem:[%s162_s5 + $0x10] sm:$0xff] %v228_v2  ;;  %v232_v4 = vld [vmem:[%s926_s4 + $0x40] sm:$0xff]  ;;  %v234_v5 = vld [vmem:[%s926_s4 + $0x50] sm:$0xff]  ;;  %231 = vst [vmem:[%s162_s5 + $0x18] sm:$0xff] %v230_v3 }
  0x19   : > { %233 = vst [vmem:[%s162_s5 + $0x20] sm:$0xff] %v232_v4  ;;  %235 = vst [vmem:[%s162_s5 + $0x28] sm:$0xff] %v234_v5  ;;  %v236_v6 = vld [vmem:[%s926_s4 + $0x60] sm:$0xff]  ;;  %v238_v7 = vld [vmem:[%s926_s4 + $0x70] sm:$0xff] }
  0x1a   : > { %v240_v8 = vld [vmem:[%s926_s4 + $0x80] sm:$0xff]  ;;  %237 = vst [vmem:[%s162_s5 + $0x30] sm:$0xff] %v236_v6  ;;  %239 = vst [vmem:[%s162_s5 + $0x38] sm:$0xff] %v238_v7  ;;  %v242_v9 = vld [vmem:[%s926_s4 + $0x90] sm:$0xff] }
  0x1b   : > { %241 = vst [vmem:[%s162_s5 + $0x40] sm:$0xff] %v240_v8  ;;  %v244_v10 = vld [vmem:[%s926_s4 + $0xa0] sm:$0xff]  ;;  %v246_v11 = vld [vmem:[%s926_s4 + $0xb0] sm:$0xff]  ;;  %243 = vst [vmem:[%s162_s5 + $0x48] sm:$0xff] %v242_v9 }
  0x1c   : > { %245 = vst [vmem:[%s162_s5 + $0x50] sm:$0xff] %v244_v10  ;;  %247 = vst [vmem:[%s162_s5 + $0x58] sm:$0xff] %v246_v11  ;;  %v248_v12 = vld [vmem:[%s926_s4 + $0xc0] sm:$0xff]  ;;  %v250_v13 = vld [vmem:[%s926_s4 + $0xd0] sm:$0xff] }
  0x1d   : > { %v252_v14 = vld [vmem:[%s926_s4 + $0xe0] sm:$0xff]  ;;  %249 = vst [vmem:[%s162_s5 + $0x60] sm:$0xff] %v248_v12  ;;  %251 = vst [vmem:[%s162_s5 + $0x68] sm:$0xff] %v250_v13  ;;  %v254_v15 = vld [vmem:[%s926_s4 + $0xf0] sm:$0xff] }
  0x1e   : > { %253 = vst [vmem:[%s162_s5 + $0x70] sm:$0xff] %v252_v14  ;;  %255 = vst [vmem:[%s162_s5 + $0x78] sm:$0xff] %v254_v15 }
  0x1f PF: > { %p627_p11 = scmp.ge.s32.totalorder %s837_s17, 1  ;;  %p260_p12 = scmp.lt.s32.totalorder %s837_s17, 3 }
  0x21   : > { %p261_p13 = pnand %p627_p11, %p260_p12 }
  0x22   : > { %s962_s18 = sand.u32 (!%p261_p13), 1, %s821_s13   ;;  %s653_s5 = sshll.u32 (!%p261_p13), %s829_s15, 8 }
  0x23   : > { %264 = sbr.rel (%p261_p13) target bundleno = 424 (0x1a8), region = 66  ;;  %s628_s23 = sshll.u32 (!%p261_p13), %s962_s18, 7 }
  0x24   : > { %s978_s26 = scalar_lea.vmem (!%p261_p13), [#allocation2], %s628_s23  ;;  %s629_s29 = sshll.u32 (!%p261_p13), %s962_s18, 6 }
  0x25   : > { %s294_s30 = scalar_lea.vmem (!%p261_p13), [#allocation3], %s629_s29  ;;  %s1010_s8 = scalar_lea.hbm (!%p261_p13), %s1061_s3, %s653_s5 }
  0x26   : > { %s525_s4 = sshll.u32 (!%p261_p13), %s294_s30, 4  ;;  %s509_s15 = scalar_lea.sflag (!%p261_p13), [#allocation4], %s962_s18  ;;  %s1005_s4 = int_to_ptr.vmem [resolvable:$true] %s525_s4 }
  0x27   : > { %s761_s9 = scalar_lea.vmem (!%p261_p13), %s1005_s4, 1024  ;;  %s840_s10 = smov (!%p261_p13), [#allocation3]  }
  0x28   : > { %v949_v16 = vld [vmem:[%s1058_s0 + $0x10] sm:$0xff]  ;;  %v954_v17 = vld [vmem:[%s1058_s0] sm:$0xff]  ;;  %v959_v18 = vld [vmem:[%s1058_s0 + $0x18] sm:$0xff]  ;;  %v839_v35 = vmov 0   ;;  %p762_p0 = scmp.ne.s32.totalorder %s1005_s4, %s761_s9  ;;  %s765_s11 = sshll.u32 %s840_s10, 4  ;;  %s766_s11 = int_to_ptr.vmem [resolvable:$false] %s765_s11 }
  0x29   : > { %v311_v19 = vmul.f32 %v949_v16, %v949_v16  ;;  %v309_v20 = vmul.f32 %v954_v17, %v954_v17  ;;  %v971_v21 = vld [vmem:[%s1058_s0 + $0x8] sm:$0xff]  ;;  %v312_v22 = vmul.f32 %v959_v18, %v959_v18  ;;  %v729_v24 = vld [vmem:[%s978_s26 + $0x74] ss:$8 sps:$4 sm:$0xff]   ;;  %v731_v25 = vld [vmem:[%s978_s26 + $0x70] ss:$8 sps:$4 sm:$0xff]   ;;  %479 = vmatprep.mubr.bf16.mxu0 %v839_v35  ;;  %489 = vmatprep.mubr.bf16.mxu1 %v839_v35  ;;  %s767_s19 = scalar_lea.vmem %s766_s11, 2048  ;;  %p768_p3 = scmp.lt.s32.totalorder %s1005_s4, %s766_s11 }
  0x2a   : > { %v310_v23 = vmul.f32 %v971_v21, %v971_v21  ;;  %447 = vmatprep.subr.bf16.mxu0 %v729_v24  ;;  %654 = vmatprep.subr.bf16.mxu1 %v729_v24  ;;  %v732_v26 = vld [vmem:[%s978_s26 + $0x64] ss:$8 sps:$4 sm:$0xff]   ;;  %v734_v27 = vld [vmem:[%s978_s26 + $0x60] ss:$8 sps:$4 sm:$0xff]   ;;  %v735_v28 = vld [vmem:[%s978_s26 + $0x54] ss:$8 sps:$4 sm:$0xff]   ;;  %p763_p1 = pnand %p762_p0, %p903_p5  ;;  %p769_p4 = scmp.lt.s32.totalorder %s767_s19, %s761_s9 }
  0x2b   : > { %317 = vadd.xlane.f32.xlu1 %v311_v19  ;;  %313 = vadd.xlane.f32.xlu0 %v309_v20  ;;  %v737_v29 = vld [vmem:[%s978_s26 + $0x50] ss:$8 sps:$4 sm:$0xff]   ;;  %v738_v30 = vld [vmem:[%s978_s26 + $0x44] ss:$8 sps:$4 sm:$0xff]   ;;  %v740_v31 = vld [vmem:[%s978_s26 + $0x40] ss:$8 sps:$4 sm:$0xff]  }
  0x2c   : > { %448 = vmatpush1.bf16.msra.mxu0 %v731_v25  ;;  %662 = vmatpush1.bf16.msra.mxu1 %v731_v25  ;;  %v741_v32 = vld [vmem:[%s978_s26 + $0x34] ss:$8 sps:$4 sm:$0xff]   ;;  %v743_v33 = vld [vmem:[%s978_s26 + $0x30] ss:$8 sps:$4 sm:$0xff]   ;;  %v744_v34 = vld [vmem:[%s978_s26 + $0x24] ss:$8 sps:$4 sm:$0xff]   ;;  %p764_p2 = pneg %p763_p1  ;;  %p770_p6 = por %p769_p4, %p768_p3 }
  0x2d   : > { %449 = vmatprep.subr.bf16.mxu0 %v732_v26  ;;  %655 = vmatprep.subr.bf16.mxu1 %v732_v26  ;;  %v746_v36 = vld [vmem:[%s978_s26 + $0x20] ss:$8 sps:$4 sm:$0xff]   ;;  %v747_v37 = vld [vmem:[%s978_s26 + $0x14] ss:$8 sps:$4 sm:$0xff]   ;;  %v749_v38 = vld [vmem:[%s978_s26 + $0x10] ss:$8 sps:$4 sm:$0xff]  }
  0x2e   : > { %v750_v39 = vld [vmem:[%s978_s26 + $0x4] ss:$8 sps:$4 sm:$0xff]   ;;  %v752_v40 = vld [vmem:[%s978_s26] ss:$8 sps:$4 sm:$0xff]   ;;  %p771_p7 = pnand %p770_p6, %p764_p2 }
  0x2f   : > { %319 = vadd.xlane.f32.xlu1 %v312_v22  ;;  %315 = vadd.xlane.f32.xlu0 %v310_v23  ;;  %v630_v58 = vld [vmem:[%s1059_s1] ss:$0 sm:$0xff] }
  0x30   : > { %450 = vmatpush1.bf16.msra.mxu0 %v734_v27  ;;  %663 = vmatpush1.bf16.msra.mxu1 %v734_v27 }
  0x31   : > { %451 = vmatprep.subr.bf16.mxu0 %v735_v28  ;;  %656 = vmatprep.subr.bf16.mxu1 %v735_v28 }
  0x34   : > { %452 = vmatpush1.bf16.msra.mxu0 %v737_v29  ;;  %664 = vmatpush1.bf16.msra.mxu1 %v737_v29 }
  0x35   : > { %453 = vmatprep.subr.bf16.mxu0 %v738_v30  ;;  %657 = vmatprep.subr.bf16.mxu1 %v738_v30 }
  0x38   : > { %454 = vmatpush1.bf16.msra.mxu0 %v740_v31  ;;  %665 = vmatpush1.bf16.msra.mxu1 %v740_v31 }
  0x39   : > { %455 = vmatprep.subr.bf16.mxu0 %v741_v32  ;;  %658 = vmatprep.subr.bf16.mxu1 %v741_v32 }
  0x3c   : > { %456 = vmatpush1.bf16.msra.mxu0 %v743_v33  ;;  %666 = vmatpush1.bf16.msra.mxu1 %v743_v33 }
  0x3d   : > { %457 = vmatprep.subr.bf16.mxu0 %v744_v34  ;;  %659 = vmatprep.subr.bf16.mxu1 %v744_v34 }
  0x40   : > { %458 = vmatpush1.bf16.msra.mxu0 %v746_v36  ;;  %667 = vmatpush1.bf16.msra.mxu1 %v746_v36 }
  0x41   : > { %459 = vmatprep.subr.bf16.mxu0 %v747_v37  ;;  %660 = vmatprep.subr.bf16.mxu1 %v747_v37 }
  0x44   : > { %460 = vmatpush1.bf16.msra.mxu0 %v749_v38  ;;  %668 = vmatpush1.bf16.msra.mxu1 %v749_v38 }
  0x45   : > { %461 = vmatprep.subr.bf16.mxu0 %v750_v39  ;;  %661 = vmatprep.subr.bf16.mxu1 %v750_v39 }
  0x48   : > { %462 = vmatpush1.bf16.msra.mxu0 %v752_v40  ;;  %669 = vmatpush1.bf16.msra.mxu1 %v752_v40 }
  0xb4   : > { %v318_v41 = vpop.xlane.xlu1 %317  ;;  %v314_v42 = vpop.xlane.xlu0 %313 }
  0xb5   : > { %v324_v43 = vmul.f32 0.0078125, %v318_v41  ;;  %v322_v44 = vmul.f32 0.0078125, %v314_v42 }
  0xb7   : > { %v328_v45 = vadd.f32 1e-05, %v324_v43  ;;  %v326_v46 = vadd.f32 1e-05, %v322_v44 }
  0xb8   : > { %v320_v47 = vpop.xlane.xlu1 %319  ;;  %v316_v48 = vpop.xlane.xlu0 %315 }
  0xb9   : > { %753 = vrsqrt.f32 %v328_v45  ;;  %v325_v49 = vmul.f32 0.0078125, %v320_v47  ;;  %v323_v50 = vmul.f32 0.0078125, %v316_v48 }
  0xba   : > { %755 = vrsqrt.f32 %v326_v46 }
  0xbb   : > { %v329_v51 = vadd.f32 1e-05, %v325_v49  ;;  %v327_v52 = vadd.f32 1e-05, %v323_v50 }
  0xbd   : > { %757 = vrsqrt.f32 %v329_v51 }
  0xbe   : > { %759 = vrsqrt.f32 %v327_v52 }
  0xc6   : > { %v754_v53 = vpop.eup %753 }
  0xc7   : > { %v756_v54 = vpop.eup %755  ;;  %v336_v55 = vmul.f32 %v754_v53, %v949_v16 }
  0xc8   : > { %v334_v57 = vmul.f32 %v756_v54, %v954_v17 }
  0xc9   : > { %v347_v62 = vmul.f32 %v630_v58, %v336_v55 }
  0xca   : > { %v758_v56 = vpop.eup %757  ;;  %v345_v0 = vmul.f32 %v630_v58, %v334_v57 }
  0xcb   : > { %v760_v59 = vpop.eup %759  ;;  %v337_v60 = vmul.f32 %v758_v56, %v959_v18 }
  0xcc   : > { %v335_v61 = vmul.f32 %v760_v59, %v971_v21 }
  0xcd   : > { %v348_v63 = vmul.f32 %v630_v58, %v337_v60 }
  0xce   : > { %v346_v1 = vmul.f32 %v630_v58, %v335_v61 }
  0xcf   : > { %v350_v2 = vpack.c.bf16 %v348_v63, %v347_v62 }
  0xd0   : > { %v349_v3 = vpack.c.bf16 %v346_v1, %v345_v0 }
  0xd1   : > { %490 = vmatmul.mubr.bf16.vlgmr.msra.gmra.mxu1 %v350_v2 }
  0xd2   : > { %480 = vmatmul.mubr.bf16.vlgmr.msra.gmra.mxu0 %v349_v3 }
 0x191   : > { %v491_v4 = vpop.f32.mrf.mxu1 }
 0x192   : > { %v481_v5 = vpop.f32.mrf.mxu0  ;;  %504 = vst [vmem:[%s294_s30 + $0x20] sm:$0xff] %v491_v4 }
 0x193   : > { %500 = vst [vmem:[%s294_s30] sm:$0xff] %v481_v5  ;;  %v493_v6 = vpop.f32.mrf.mxu1 }
 0x194   : > { %v483_v7 = vpop.f32.mrf.mxu0  ;;  %505 = vst [vmem:[%s294_s30 + $0x28] sm:$0xff] %v493_v6 }
 0x195   : > { %501 = vst [vmem:[%s294_s30 + $0x8] sm:$0xff] %v483_v7  ;;  %v495_v8 = vpop.f32.mrf.mxu1 }
 0x196   : > { %v485_v9 = vpop.f32.mrf.mxu0  ;;  %506 = vst [vmem:[%s294_s30 + $0x30] sm:$0xff] %v495_v8 }
 0x197   : > { %502 = vst [vmem:[%s294_s30 + $0x10] sm:$0xff] %v485_v9  ;;  %v497_v10 = vpop.f32.mrf.mxu1 }
 0x198   : > { %v487_v11 = vpop.f32.mrf.mxu0  ;;  %507 = vst [vmem:[%s294_s30 + $0x38] sm:$0xff] %v497_v10 }
 0x199   : > { %503 = vst [vmem:[%s294_s30 + $0x18] sm:$0xff] %v487_v11 }
 0x19a   : > { %774 = shalt.err (!%p771_p7)
}
 0x19b   : > { %s775_s21 = scalar_lea.hbm %s1010_s8, 1024  ;;  %s779_s27 = scalar_lea.hbm %s1061_s3, 2048 }
 0x19c   : > { %p776_p8 = scmp.ne.s32.totalorder %s1010_s8, %s775_s21  ;;  %p780_p13 = scmp.lt.s32.totalorder %s1010_s8, %s1061_s3 }
 0x19d   : > { %p781_p0 = scmp.lt.s32.totalorder %s779_s27, %s775_s21 }
 0x19e   : > { %p777_p11 = pnand %p776_p8, %p903_p5 }
 0x19f   : > { %p782_p1 = por %p781_p0, %p780_p13 }
 0x1a0   : > { %p778_p12 = pneg %p777_p11 }
 0x1a2   : > { %p783_p2 = pnand %p782_p1, %p778_p12 }
 0x1a4   : > { %786 = shalt.err (!%p783_p2)
}
 0x1a5   : > { %s841_s30 = smov 256   ;;  %s842_s5 = smov 512  }
 0x1a6   : > { %s843_s6 = smov 16  }
 0x1a7   : > { %670 = dma.vmem_to_hbm [thread:$0]  (%p903_p5), %s1005_s4, 1024, %s1010_s8, %s509_s15, %s841_s30, %s842_s5, %s843_s6  }
 0x1a8 PF: > { %s540_s7 = sand.u32 1, %s817_s12   ;;  %p673_p3 = pnand %p623_p10, %p914_p9 }
 0x1a9   : > { %s541_s9 = scalar_lea.sflag [#allocation4], %s540_s7 }
 0x1aa   : > { %p674_p4 = pneg %p673_p3 }
 0x1ac   : > { %812 = dma.done.wait (%p674_p4), %s541_s9, 1024  }
 0x1ad   : > { %814 = vsyncadd (%p674_p4), %s541_s9, 4294966272  ;;  %s16_s17 = sadd.s32 1, %s837_s17   ;;  %s1064_s12 = smov %s821_s13 }
 0x1ae   : > { %p13_p6 = scmp.ge.s32.totalorder %s16_s17, 4   ;;  %s1065_s13 = smov %s825_s14 }
 0x1af   : > { %s1066_s14 = smov %s912_s24  ;;  %s1067_s15 = smov %s833_s16 }
 0x1b0   : > { %s1068_s16 = smov %s1070_s20  ;;  %15 = sbr.rel (!%p13_p6) target bundleno = 4 (0x4), region = 113 }
 0x1b5   :  { %546 = vsyncpa [#allocation4], 1 }
 0x1b6   :  { %548 = vsyncpa [#allocation4 + $0x1], 1 }

// kernel: llama_forward.12
= control target key start
LH: loop header
LB: loop body
LE: loop exit
PB: predicated region body
PF: predicated region fallthrough
CT: control target
= control target key end

     0   :  { %v825_v34 = vmov 0   ;;  %s1050_s0 = inlined_call_operand.vmem [shape: f32[32,128], index: 0, kind: input, shape index: {}]   ;;  %s1051_s2 = inlined_call_operand.vmem [shape: bf16[128,512], index: 2, kind: input, shape index: {}]   ;;  %s1052_s1 = inlined_call_operand.vmem [shape: f32[1,128], index: 1, kind: input, shape index: {}]   ;;  %s1053_s3 = inlined_call_operand.vmem [shape: bf16[256,128], index: 3, kind: input, shape index: {}]   ;;  %s1054_s4 = inlined_call_operand.vmem [shape: f32[32,128], index: 4, kind: output, shape index: {}]  }
   0x1   :  { %v854_v0 = vld [vmem:[%s1050_s0] sm:$0xff]  ;;  %v859_v1 = vld [vmem:[%s1050_s0 + $0x10] sm:$0xff]  ;;  %v864_v2 = vld [vmem:[%s1050_s0 + $0x8] sm:$0xff]  ;;  %288 = vmatprep.mubr.bf16.mxu0 %v825_v34  ;;  %341 = vmatprep.mubr.bf16.mxu1 %v825_v34 }
   0x2   :  { %v22_v3 = vmul.f32 %v854_v0, %v854_v0  ;;  %v24_v4 = vmul.f32 %v859_v1, %v859_v1  ;;  %v873_v5 = vld [vmem:[%s1050_s0 + $0x18] sm:$0xff]  ;;  %v721_v6 = vld [vmem:[%s1051_s2 + $0xe4] ss:$16 sps:$4 sm:$0xff]   ;;  %v23_v7 = vmul.f32 %v864_v2, %v864_v2  ;;  %v725_v10 = vld [vmem:[%s1051_s2 + $0xe0] ss:$16 sps:$4 sm:$0xff]  }
   0x3   :  { %v25_v8 = vmul.f32 %v873_v5, %v873_v5  ;;  %v723_v9 = vld [vmem:[%s1051_s2 + $0xec] ss:$16 sps:$4 sm:$0xff]   ;;  %v726_v11 = vld [vmem:[%s1051_s2 + $0xe8] ss:$16 sps:$4 sm:$0xff]   ;;  %256 = vmatprep.subr.bf16.mxu0 %v721_v6  ;;  %v727_v12 = vld [vmem:[%s1051_s2 + $0xc4] ss:$16 sps:$4 sm:$0xff]  }
   0x4   :  { %26 = vadd.xlane.f32.xlu0 %v22_v3  ;;  %30 = vadd.xlane.f32.xlu1 %v24_v4  ;;  %v729_v13 = vld [vmem:[%s1051_s2 + $0xcc] ss:$16 sps:$4 sm:$0xff]   ;;  %v731_v14 = vld [vmem:[%s1051_s2 + $0xc0] ss:$16 sps:$4 sm:$0xff]   ;;  %v732_v15 = vld [vmem:[%s1051_s2 + $0xc8] ss:$16 sps:$4 sm:$0xff]  }
   0x5   :  { %309 = vmatprep.subr.bf16.mxu1 %v723_v9  ;;  %257 = vmatpush1.bf16.msra.mxu0 %v725_v10  ;;  %v733_v16 = vld [vmem:[%s1051_s2 + $0xa4] ss:$16 sps:$4 sm:$0xff]   ;;  %v735_v17 = vld [vmem:[%s1051_s2 + $0xac] ss:$16 sps:$4 sm:$0xff]   ;;  %v737_v18 = vld [vmem:[%s1051_s2 + $0xa0] ss:$16 sps:$4 sm:$0xff]  }
   0x6   :  { %310 = vmatpush1.bf16.msra.mxu1 %v726_v11  ;;  %258 = vmatprep.subr.bf16.mxu0 %v727_v12  ;;  %v738_v19 = vld [vmem:[%s1051_s2 + $0xa8] ss:$16 sps:$4 sm:$0xff]   ;;  %v739_v20 = vld [vmem:[%s1051_s2 + $0x84] ss:$16 sps:$4 sm:$0xff]   ;;  %v741_v21 = vld [vmem:[%s1051_s2 + $0x8c] ss:$16 sps:$4 sm:$0xff]  }
   0x7   :  { %311 = vmatprep.subr.bf16.mxu1 %v729_v13  ;;  %v743_v22 = vld [vmem:[%s1051_s2 + $0x80] ss:$16 sps:$4 sm:$0xff]   ;;  %v744_v23 = vld [vmem:[%s1051_s2 + $0x88] ss:$16 sps:$4 sm:$0xff]   ;;  %v745_v24 = vld [vmem:[%s1051_s2 + $0x64] ss:$16 sps:$4 sm:$0xff]  }
   0x8   :  { %28 = vadd.xlane.f32.xlu0 %v23_v7  ;;  %32 = vadd.xlane.f32.xlu1 %v25_v8  ;;  %v747_v25 = vld [vmem:[%s1051_s2 + $0x6c] ss:$16 sps:$4 sm:$0xff]   ;;  %v749_v26 = vld [vmem:[%s1051_s2 + $0x60] ss:$16 sps:$4 sm:$0xff]   ;;  %v750_v27 = vld [vmem:[%s1051_s2 + $0x68] ss:$16 sps:$4 sm:$0xff]  }
   0x9   :  { %259 = vmatpush1.bf16.msra.mxu0 %v731_v14  ;;  %v751_v28 = vld [vmem:[%s1051_s2 + $0x44] ss:$16 sps:$4 sm:$0xff]   ;;  %v753_v29 = vld [vmem:[%s1051_s2 + $0x4c] ss:$16 sps:$4 sm:$0xff]   ;;  %v755_v30 = vld [vmem:[%s1051_s2 + $0x40] ss:$16 sps:$4 sm:$0xff]  }
   0xa   :  { %312 = vmatpush1.bf16.msra.mxu1 %v732_v15  ;;  %260 = vmatprep.subr.bf16.mxu0 %v733_v16  ;;  %v756_v31 = vld [vmem:[%s1051_s2 + $0x48] ss:$16 sps:$4 sm:$0xff]   ;;  %v757_v32 = vld [vmem:[%s1051_s2 + $0x24] ss:$16 sps:$4 sm:$0xff]   ;;  %v759_v33 = vld [vmem:[%s1051_s2 + $0x2c] ss:$16 sps:$4 sm:$0xff]  }
   0xb   :  { %313 = vmatprep.subr.bf16.mxu1 %v735_v17  ;;  %v761_v35 = vld [vmem:[%s1051_s2 + $0x20] ss:$16 sps:$4 sm:$0xff]   ;;  %v762_v36 = vld [vmem:[%s1051_s2 + $0x28] ss:$16 sps:$4 sm:$0xff]   ;;  %v763_v37 = vld [vmem:[%s1051_s2 + $0x4] ss:$16 sps:$4 sm:$0xff]  }
   0xc   :  { %v765_v38 = vld [vmem:[%s1051_s2 + $0xc] ss:$16 sps:$4 sm:$0xff]   ;;  %v767_v39 = vld [vmem:[%s1051_s2] ss:$16 sps:$4 sm:$0xff]   ;;  %v768_v40 = vld [vmem:[%s1051_s2 + $0x8] ss:$16 sps:$4 sm:$0xff]  }
   0xd   :  { %261 = vmatpush1.bf16.msra.mxu0 %v737_v18  ;;  %v619_v56 = vld [vmem:[%s1052_s1] ss:$0 sm:$0xff]  ;;  %v769_v8 = vld [vmem:[%s1053_s3 + $0x78] sm:$0xff]   ;;  %v771_v10 = vld [vmem:[%s1053_s3 + $0x70] sm:$0xff]  }
   0xe   :  { %314 = vmatpush1.bf16.msra.mxu1 %v738_v19  ;;  %262 = vmatprep.subr.bf16.mxu0 %v739_v20  ;;  %v770_v9 = vld [vmem:[%s1053_s3 + $0x38] sm:$0xff]   ;;  %v772_v11 = vld [vmem:[%s1053_s3 + $0x30] sm:$0xff]   ;;  %v773_v12 = vld [vmem:[%s1053_s3 + $0x68] sm:$0xff]  }
   0xf   :  { %315 = vmatprep.subr.bf16.mxu1 %v741_v21  ;;  %v774_v13 = vld [vmem:[%s1053_s3 + $0x28] sm:$0xff]   ;;  %v775_v14 = vld [vmem:[%s1053_s3 + $0x60] sm:$0xff]   ;;  %v777_v16 = vld [vmem:[%s1053_s3 + $0x58] sm:$0xff]  }
  0x10   :  { %v776_v15 = vld [vmem:[%s1053_s3 + $0x20] sm:$0xff]   ;;  %v778_v17 = vld [vmem:[%s1053_s3 + $0x18] sm:$0xff]   ;;  %v779_v18 = vld [vmem:[%s1053_s3 + $0x50] sm:$0xff]  }
  0x11   :  { %263 = vmatpush1.bf16.msra.mxu0 %v743_v22  ;;  %v780_v19 = vld [vmem:[%s1053_s3 + $0x10] sm:$0xff]   ;;  %v781_v20 = vld [vmem:[%s1053_s3 + $0x48] sm:$0xff]   ;;  %v783_v22 = vld [vmem:[%s1053_s3 + $0x40] sm:$0xff]  }
  0x12   :  { %316 = vmatpush1.bf16.msra.mxu1 %v744_v23  ;;  %264 = vmatprep.subr.bf16.mxu0 %v745_v24  ;;  %v782_v21 = vld [vmem:[%s1053_s3 + $0x8] sm:$0xff]   ;;  %v784_v23 = vld [vmem:[%s1053_s3] sm:$0xff]  }
  0x13   :  { %317 = vmatprep.subr.bf16.mxu1 %v747_v25 }
  0x15   :  { %265 = vmatpush1.bf16.msra.mxu0 %v749_v26 }
  0x16   :  { %318 = vmatpush1.bf16.msra.mxu1 %v750_v27  ;;  %266 = vmatprep.subr.bf16.mxu0 %v751_v28 }
  0x17   :  { %319 = vmatprep.subr.bf16.mxu1 %v753_v29 }
  0x19   :  { %267 = vmatpush1.bf16.msra.mxu0 %v755_v30 }
  0x1a   :  { %320 = vmatpush1.bf16.msra.mxu1 %v756_v31  ;;  %268 = vmatprep.subr.bf16.mxu0 %v757_v32 }
  0x1b   :  { %321 = vmatprep.subr.bf16.mxu1 %v759_v33 }
  0x1d   :  { %269 = vmatpush1.bf16.msra.mxu0 %v761_v35 }
  0x1e   :  { %322 = vmatpush1.bf16.msra.mxu1 %v762_v36  ;;  %270 = vmatprep.subr.bf16.mxu0 %v763_v37 }
  0x1f   :  { %323 = vmatprep.subr.bf16.mxu1 %v765_v38 }
  0x21   :  { %271 = vmatpush1.bf16.msra.mxu0 %v767_v39 }
  0x22   :  { %324 = vmatpush1.bf16.msra.mxu1 %v768_v40  ;;  %676 = vmatprep.subr.bf16.mxu0 %v769_v8 }
  0x23   :  { %704 = vmatprep.subr.bf16.mxu1 %v769_v8 }
  0x8d   :  { %v27_v41 = vpop.xlane.xlu0 %26  ;;  %v31_v42 = vpop.xlane.xlu1 %30 }
  0x8e   :  { %v35_v43 = vmul.f32 0.0078125, %v27_v41  ;;  %v37_v44 = vmul.f32 0.0078125, %v31_v42 }
  0x90   :  { %v39_v45 = vadd.f32 1e-05, %v35_v43  ;;  %v41_v50 = vadd.f32 1e-05, %v37_v44 }
  0x91   :  { %v29_v46 = vpop.xlane.xlu0 %28  ;;  %v33_v47 = vpop.xlane.xlu1 %32 }
  0x92   :  { %785 = vrsqrt.f32 %v39_v45  ;;  %v36_v48 = vmul.f32 0.0078125, %v29_v46  ;;  %v38_v49 = vmul.f32 0.0078125, %v33_v47 }
  0x94   :  { %v40_v51 = vadd.f32 1e-05, %v36_v48  ;;  %v42_v52 = vadd.f32 1e-05, %v38_v49 }
  0x96   :  { %787 = vrsqrt.f32 %v40_v51 }
  0x97   :  { %789 = vrsqrt.f32 %v41_v50 }
  0x98   :  { %791 = vrsqrt.f32 %v42_v52 }
  0x9f   :  { %v786_v53 = vpop.eup %785 }
  0xa0   :  { %v47_v54 = vmul.f32 %v786_v53, %v854_v0 }
  0xa2   :  { %v58_v60 = vmul.f32 %v619_v56, %v47_v54 }
  0xa3   :  { %v788_v55 = vpop.eup %787 }
  0xa4   :  { %v790_v57 = vpop.eup %789  ;;  %v48_v58 = vmul.f32 %v788_v55, %v864_v2 }
  0xa5   :  { %v792_v59 = vpop.eup %791  ;;  %v49_v63 = vmul.f32 %v790_v57, %v859_v1 }
  0xa6   :  { %v59_v61 = vmul.f32 %v619_v56, %v48_v58  ;;  %v50_v3 = vmul.f32 %v792_v59, %v873_v5 }
  0xa7   :  { %v60_v4 = vmul.f32 %v619_v56, %v49_v63 }
  0xa8   :  { %v62_v62 = vpack.c.bf16 %v59_v61, %v58_v60  ;;  %v61_v6 = vmul.f32 %v619_v56, %v50_v3 }
  0xaa   :  { %289 = vmatmul.mubr.bf16.vlgmr.msra.gmra.mxu0 %v62_v62  ;;  %342 = vmatmul.mubr.bf16.vlgmr.msra.gmra.mxu1 %v62_v62  ;;  %v63_v7 = vpack.c.bf16 %v61_v6, %v60_v4 }
  0xab   :  { %298 = vmatprep.mubr.bf16.mxu0 %v825_v34  ;;  %351 = vmatprep.mubr.bf16.mxu1 %v825_v34 }
  0xac   :  { %677 = vmatpush3.bf16.msra.mxu0 %v770_v9  ;;  %712 = vmatpush3.bf16.msra.mxu1 %v770_v9 }
  0xad   :  { %678 = vmatprep.subr.bf16.mxu0 %v771_v10  ;;  %705 = vmatprep.subr.bf16.mxu1 %v771_v10 }
  0xb0   :  { %679 = vmatpush3.bf16.msra.mxu0 %v772_v11  ;;  %713 = vmatpush3.bf16.msra.mxu1 %v772_v11 }
  0xb1   :  { %680 = vmatprep.subr.bf16.mxu0 %v773_v12  ;;  %706 = vmatprep.subr.bf16.mxu1 %v773_v12 }
  0xb2   :  { %299 = vmatmul.mubr.bf16.gmra.mxu0 %v63_v7  ;;  %352 = vmatmul.mubr.bf16.gmra.mxu1 %v63_v7 }
  0xb4   :  { %681 = vmatpush3.bf16.msra.mxu0 %v774_v13  ;;  %714 = vmatpush3.bf16.msra.mxu1 %v774_v13 }
  0xb5   :  { %682 = vmatprep.subr.bf16.mxu0 %v775_v14  ;;  %707 = vmatprep.subr.bf16.mxu1 %v775_v14 }
  0xb8   :  { %683 = vmatpush3.bf16.msra.mxu0 %v776_v15  ;;  %715 = vmatpush3.bf16.msra.mxu1 %v776_v15 }
  0xb9   :  { %684 = vmatprep.subr.bf16.mxu0 %v777_v16  ;;  %708 = vmatprep.subr.bf16.mxu1 %v777_v16 }
  0xbc   :  { %685 = vmatpush3.bf16.msra.mxu0 %v778_v17  ;;  %716 = vmatpush3.bf16.msra.mxu1 %v778_v17 }
  0xbd   :  { %686 = vmatprep.subr.bf16.mxu0 %v779_v18  ;;  %709 = vmatprep.subr.bf16.mxu1 %v779_v18 }
  0xc0   :  { %687 = vmatpush3.bf16.msra.mxu0 %v780_v19  ;;  %717 = vmatpush3.bf16.msra.mxu1 %v780_v19 }
  0xc1   :  { %688 = vmatprep.subr.bf16.mxu0 %v781_v20  ;;  %710 = vmatprep.subr.bf16.mxu1 %v781_v20 }
  0xc4   :  { %689 = vmatpush3.bf16.msra.mxu0 %v782_v21  ;;  %718 = vmatpush3.bf16.msra.mxu1 %v782_v21 }
  0xc5   :  { %690 = vmatprep.subr.bf16.mxu0 %v783_v22  ;;  %711 = vmatprep.subr.bf16.mxu1 %v783_v22 }
  0xc8   :  { %691 = vmatpush3.bf16.msra.mxu0 %v784_v23  ;;  %719 = vmatpush3.bf16.msra.mxu1 %v784_v23 }
 0x16a   :  { %v290_v24 = vpop.f32.mrf.mxu0  ;;  %v343_v45 = vpop.f32.mrf.mxu1 }
 0x16b   :  { %v652_v25 = vmul.f32 -1.442695, %v290_v24 }
 0x16c   :  { %v292_v26 = vpop.f32.mrf.mxu0  ;;  %v345_v50 = vpop.f32.mrf.mxu1 }
 0x16d   :  { %793 = vpow2.f32 %v652_v25  ;;  %v653_v27 = vmul.f32 -1.442695, %v292_v26 }
 0x16e   :  { %v294_v28 = vpop.f32.mrf.mxu0  ;;  %v347_v55 = vpop.f32.mrf.mxu1 }
 0x16f   :  { %795 = vpow2.f32 %v653_v27  ;;  %v654_v29 = vmul.f32 -1.442695, %v294_v28 }
 0x170   :  { %v296_v30 = vpop.f32.mrf.mxu0  ;;  %v349_v59 = vpop.f32.mrf.mxu1 }
 0x171   :  { %797 = vpow2.f32 %v654_v29  ;;  %v655_v31 = vmul.f32 -1.442695, %v296_v30 }
 0x172   :  { %v1030_v32 = vpop.f32.mrf.mxu0  ;;  %v353_v63 = vpop.f32.mrf.mxu1 }
 0x173   :  { %799 = vpow2.f32 %v655_v31  ;;  %v656_v33 = vmul.f32 -1.442695, %v1030_v32 }
 0x174   :  { %v302_v34 = vpop.f32.mrf.mxu0  ;;  %v355_v10 = vpop.f32.mrf.mxu1 }
 0x175   :  { %801 = vpow2.f32 %v656_v33  ;;  %v657_v35 = vmul.f32 -1.442695, %v302_v34 }
 0x176   :  { %v304_v36 = vpop.f32.mrf.mxu0  ;;  %v357_v19 = vpop.f32.mrf.mxu1 }
 0x177   :  { %803 = vpow2.f32 %v657_v35  ;;  %v658_v37 = vmul.f32 -1.442695, %v304_v36 }
 0x178   :  { %v306_v38 = vpop.f32.mrf.mxu0 }
 0x179   :  { %805 = vpow2.f32 %v658_v37  ;;  %v659_v39 = vmul.f32 -1.442695, %v306_v38 }
 0x17a   :  { %v794_v40 = vpop.eup %793 }
 0x17b   :  { %807 = vpow2.f32 %v659_v39  ;;  %v386_v42 = vadd.f32 1.0, %v794_v40 }
 0x17c   :  { %v796_v41 = vpop.eup %795 }
 0x17d   :  { %v387_v43 = vadd.f32 1.0, %v796_v41 }
 0x17e   :  { %v798_v44 = vpop.eup %797 }
 0x17f   :  { %809 = vrcp.f32 %v387_v43  ;;  %v388_v46 = vadd.f32 1.0, %v798_v44 }
 0x180   :  { %v800_v47 = vpop.eup %799  ;;  %811 = vrcp.f32 %v386_v42 }
 0x181   :  { %813 = vrcp.f32 %v388_v46  ;;  %v389_v48 = vadd.f32 1.0, %v800_v47 }
 0x182   :  { %v802_v49 = vpop.eup %801 }
 0x183   :  { %815 = vrcp.f32 %v389_v48  ;;  %v390_v52 = vadd.f32 1.0, %v802_v49 }
 0x184   :  { %v804_v51 = vpop.eup %803 }
 0x185   :  { %v391_v53 = vadd.f32 1.0, %v804_v51 }
 0x186   :  { %v806_v54 = vpop.eup %805 }
 0x187   :  { %817 = vrcp.f32 %v391_v53  ;;  %v392_v56 = vadd.f32 1.0, %v806_v54 }
 0x188   :  { %v808_v57 = vpop.eup %807  ;;  %819 = vrcp.f32 %v390_v52 }
 0x189   :  { %821 = vrcp.f32 %v392_v56  ;;  %v393_v58 = vadd.f32 1.0, %v808_v57 }
 0x18b   :  { %823 = vrcp.f32 %v393_v58 }
 0x18c   :  { %v810_v60 = vpop.eup %809 }
 0x18d   :  { %v812_v61 = vpop.eup %811  ;;  %v411_v3 = vmul.f32 %v810_v60, %v292_v26  ;;  %v359_v26 = vpop.f32.mrf.mxu1 }
 0x18e   :  { %v814_v62 = vpop.eup %813  ;;  %v410_v7 = vmul.f32 %v812_v61, %v290_v24 }
 0x18f   :  { %v412_v4 = vmul.f32 %v814_v62, %v294_v28  ;;  %v419_v11 = vmul.f32 %v411_v3, %v345_v50 }
 0x190   :  { %v816_v6 = vpop.eup %815  ;;  %v418_v14 = vmul.f32 %v410_v7, %v343_v45 }
 0x191   :  { %v413_v8 = vmul.f32 %v816_v6, %v296_v30  ;;  %v420_v9 = vmul.f32 %v412_v4, %v347_v55 }
 0x193   :  { %v421_v12 = vmul.f32 %v413_v8, %v349_v59  ;;  %v426_v18 = vpack.c.bf16 %v420_v9, %v418_v14 }
 0x194   :  { %v818_v13 = vpop.eup %817 }
 0x195   :  { %v820_v15 = vpop.eup %819  ;;  %v427_v16 = vpack.c.bf16 %v421_v12, %v419_v11  ;;  %v415_v20 = vmul.f32 %v818_v13, %v302_v34 }
 0x196   :  { %v822_v17 = vpop.eup %821  ;;  %v414_v23 = vmul.f32 %v820_v15, %v1030_v32 }
 0x197   :  { %v416_v21 = vmul.f32 %v822_v17, %v304_v36  ;;  %590 = vmatprep.mubr.bf16.mxu0 %v427_v16  ;;  %v423_v27 = vmul.f32 %v415_v20, %v355_v10 }
 0x198   :  { %v824_v22 = vpop.eup %823  ;;  %591 = vmatmul.mubr.bf16.vlgmr.msra.gmra.mxu0 %v426_v18  ;;  %v422_v29 = vmul.f32 %v414_v23, %v353_v63 }
 0x199   :  { %v417_v24 = vmul.f32 %v824_v22, %v306_v38  ;;  %v424_v25 = vmul.f32 %v416_v21, %v357_v19 }
 0x19b   :  { %v425_v28 = vmul.f32 %v417_v24, %v359_v26  ;;  %v428_v31 = vpack.c.bf16 %v424_v25, %v422_v29 }
 0x19d   :  { %v429_v30 = vpack.c.bf16 %v425_v28, %v423_v27 }
 0x19f   :  { %598 = vmatprep.mubr.bf16.mxu1 %v429_v30 }
 0x1a0   :  { %599 = vmatmul.mubr.bf16.vlgmr.msra.gmra.mxu1 %v428_v31 }
 0x258   :  { %v692_v33 = vpop.f32.mrf.mxu0 }
 0x25a   :  { %v693_v35 = vpop.f32.mrf.mxu0 }
 0x25b   :  { %v694_v37 = vadd.f32 %v693_v35, %v692_v33 }
 0x25c   :  { %v695_v34 = vpop.f32.mrf.mxu0 }
 0x25d   :  { %v607_v36 = vadd.f32 %v694_v37, %v854_v0 }
 0x25e   :  { %v696_v39 = vpop.f32.mrf.mxu0 }
 0x25f   :  { %611 = vst [vmem:[%s1054_s4] sm:$0xff] %v607_v36  ;;  %v697_v32 = vadd.f32 %v696_v39, %v695_v34 }
 0x260   :  { %v698_v38 = vpop.f32.mrf.mxu1 }
 0x261   :  { %v608_v40 = vadd.f32 %v697_v32, %v864_v2 }
 0x262   :  { %v699_v41 = vpop.f32.mrf.mxu1 }
 0x263   :  { %612 = vst [vmem:[%s1054_s4 + $0x8] sm:$0xff] %v608_v40  ;;  %v700_v42 = vadd.f32 %v699_v41, %v698_v38 }
 0x264   :  { %v701_v43 = vpop.f32.mrf.mxu1 }
 0x265   :  { %v609_v44 = vadd.f32 %v700_v42, %v859_v1 }
 0x266   :  { %v702_v45 = vpop.f32.mrf.mxu1 }
 0x267   :  { %613 = vst [vmem:[%s1054_s4 + $0x10] sm:$0xff] %v609_v44  ;;  %v703_v0 = vadd.f32 %v702_v45, %v701_v43 }
 0x269   :  { %v610_v46 = vadd.f32 %v703_v0, %v873_v5 }
 0x26b   :  { %614 = vst [vmem:[%s1054_s4 + $0x18] sm:$0xff] %v610_v46 }

</bundles_post_ra>
